<compile_context>
chip_gen: v5e
topology: v5e:2x2
jax: 0.10.0
libtpu: 0.0.40
codegen_flags: <defaults>
</compile_context>

<pallas_src>
import functools
import math

import jax
import jax.numpy as jnp
from jax import lax
from jax.experimental import pallas as pl
from jax.experimental.pallas import tpu as pltpu


# ------------------------------------------------------------------ kernel


def _gru_kernel(x_ref, h0_ref, wx0_ref, wxl_ref, whzr_ref, whg_ref, bh_ref,
                wy_ref, by_ref, y_ref, h_ref, x0p_ref, yh_ref, *,
                n_layers, t_chunk, batch, h_dim, steps_per_body):
    s = pl.program_id(0)
    L, B, H = n_layers, batch, h_dim
    SPB = steps_per_body              # timesteps per fori_loop body (statically unrolled)
    RPB = SPB * B                     # rows per body slab (sublane-tile aligned)
    n_body = t_chunk // SPB
    wdt = wx0_ref.dtype               # weight / MXU-input dtype (bf16 by default)

    # Initialize the resident hidden-state carry on the first chunk.
    @pl.when(s == 0)
    def _():
        h_ref[...] = h0_ref[...]

    # Hoisted, non-recurrent layer-0 input projection for the whole chunk, staged in
    # VMEM so the serial recurrence only does cheap aligned slab reads:
    #   (T*B, I) @ (I, 3H) -> (T*B, 3H), columns packed as [z | r | g].
    x0p_ref[...] = jnp.dot(x_ref[...], wx0_ref[...],
                           preferred_element_type=jnp.float32)

    # Hoist bias loads + broadcasts out of the time loop (JAX does not CSE
    # broadcast_in_dim inside loops).
    bh = bh_ref[...]                                            # (L, 1, 3H) = [bz|br|bg]
    b_zr = [jnp.broadcast_to(bh[i, :, :2 * H], (B, 2 * H)) for i in range(L)]
    b_g = [jnp.broadcast_to(bh[i, :, 2 * H:], (B, H)) for i in range(L)]

    # Hidden state is register-resident for the whole chunk: one load here, one store
    # after the loop, instead of 2*L*T small VMEM accesses (vst slot is scarce on v5e).
    hs0 = tuple(h_ref[i] for i in range(L))

    def body(j, hs):
        hs = list(hs)
        base = j * RPB
        if not isinstance(base, int):
            base = pl.multiple_of(base, 8)                      # sublane-tile aligned
        xp_blk = x0p_ref[pl.ds(base, RPB), :]                   # (RPB, 3H) f32, one read
        y_rows = []
        for k in range(SPB):                                    # static unroll in-body
            xp0 = xp_blk[k * B:(k + 1) * B, :]                  # (B, 3H)
            # The L recurrent z/r projections depend only on the start-of-step hidden
            # states -> issue them up-front so MXU pops overlap the sigmoid/tanh chain
            # of earlier layers (this kernel is latency-bound at small B).
            hzr = [jnp.dot(hs[i].astype(wdt), whzr_ref[i],
                           preferred_element_type=jnp.float32)  # (B, 2H) = [hz | hr]
                   for i in range(L)]
            inp = None
            for i in range(L):
                h = hs[i]
                if i == 0:
                    xp = xp0
                else:
                    xp = jnp.dot(inp.astype(wdt), wxl_ref[i - 1],
                                 preferred_element_type=jnp.float32)  # (B, 3H)
                # NOTE: at toy H these lane slices cut inside one 128-lane tile;
                # at real sizes keep H a multiple of 128 so they are free views.
                zr = jax.nn.sigmoid(xp[:, :2 * H] + hzr[i] + b_zr[i])
                z = zr[:, :H]
                r = zr[:, H:]
                g = jnp.tanh(xp[:, 2 * H:]
                             + jnp.dot((r * h).astype(wdt), whg_ref[i],
                                       preferred_element_type=jnp.float32)
                             + b_g[i])
                h_new = h * z + (1.0 - z) * g
                hs[i] = h_new
                inp = h_new
                # TODO(synk): inter-layer dropout is a no-op in the reference forward
                # (the next layer reads layer_states[i-1], never the dropped x).
            y_rows.append(inp)
        # One aligned (RPB, H) store of this body's last-layer outputs, staged in the
        # narrow weight dtype for the fused end-of-chunk output projection.
        yh_ref[pl.ds(base, RPB), :] = (
            jnp.concatenate(y_rows, axis=0).astype(yh_ref.dtype))
        return tuple(hs)

    if n_body == 1:
        hs_out = body(0, hs0)
    else:
        # Bounded-size loop body (SPB timesteps of straight-line code) instead of a
        # full Python unroll of the chunk: keeps code size / live ranges in check at
        # real sequence lengths while still giving the scheduler an overlap window.
        hs_out = lax.fori_loop(0, n_body, body, hs0)

    # Write the hidden carry back to VMEM once per chunk.
    for i in range(L):
        h_ref[i] = hs_out[i]

    # One wide output projection and one dense (T*B, O) store per chunk.
    y_ref[...] = (jnp.dot(yh_ref[...], wy_ref[...],
                          preferred_element_type=jnp.float32) + by_ref[...])


# ------------------------------------------------------------------ wrapper helpers


def _pick_time_chunk(seq_len, batch, max_chunk):
    """Largest T <= max_chunk with T | seq_len and (T*batch) % 8 == 0 (sublane rule)."""
    best = None
    for t in range(1, min(seq_len, max_chunk) + 1):
        if seq_len % t == 0 and (t * batch) % 8 == 0:
            best = t
    return best if best is not None else seq_len


def _steps_per_body(t_chunk, batch, staging_itemsize, target=8):
    """Timesteps per fori_loop body: keeps per-body slab reads/stores aligned to the
    native sublane tile (8 rows f32, 16 rows bf16) and bounds in-body unroll ~target."""
    row_align = 8 * max(1, 4 // staging_itemsize)
    if (t_chunk * batch) % row_align != 0:
        return t_chunk                          # single body covering the whole chunk
    step = row_align // math.gcd(batch, row_align)
    best = None
    for spb in range(step, t_chunk + 1, step):
        if t_chunk % spb == 0 and spb <= max(target, step):
            best = spb
    return best if best is not None else t_chunk


def _block_vmem_bytes(shape, dtype):
    """Rough VMEM footprint of one block, padded to the native (8,128) 32-bit tiling."""
    itemsize = jnp.dtype(dtype).itemsize
    sub = 8 * max(1, 4 // itemsize)
    dims = list(shape)
    dims[-1] = -(-dims[-1] // 128) * 128
    if len(dims) >= 2:
        dims[-2] = -(-dims[-2] // sub) * sub
    n = 1
    for d in dims:
        n *= int(d)
    return n * itemsize


def prepare_params(params, weight_dtype=jnp.bfloat16):
    """One-time repack of the reference-layout weights into the fused kernel layout
    (hoisted out of the forward pass so transposes/casts are not paid per call)."""
    wx0, wxl, wh, bh, wy, by = (params[k] for k in ("wx0", "wxl", "wh", "bh", "wy", "by"))
    I = wx0.shape[1]
    L, _, H, _ = wh.shape
    Lm1 = wxl.shape[0]
    return {
        # Fused input projections, columns packed as [z | r | g].
        "wx0": jnp.moveaxis(wx0, 0, 1).reshape(I, 3 * H).astype(weight_dtype),
        "wxl": jnp.moveaxis(wxl, 1, 2).reshape(Lm1, H, 3 * H).astype(weight_dtype),
        # Fused recurrent z/r projection ([hz | hr]) and the separate g projection.
        "whzr": jnp.moveaxis(wh[:, :2], 1, 2).reshape(L, H, 2 * H).astype(weight_dtype),
        "whg": wh[:, 2].astype(weight_dtype),
        # Biases stay f32 (added on the f32 accumulator path).
        "bh": jnp.moveaxis(bh, 1, 2).reshape(L, 1, 3 * H).astype(jnp.float32),
        "wy": wy.astype(weight_dtype),
        "by": by.astype(jnp.float32),
    }


def multilayer_gru_forward(packed, x_bsi, hidden_state_blh=None, *,
                           max_time_chunk=32, weight_buffer_count=None,
                           vmem_limit_bytes=None):
    """PyTorch-convention wrapper: x (B,S,I), hidden (B,L,H) -> (y (B,S,O), h (B,L,H)).

    `packed` comes from prepare_params().  `weight_buffer_count=1` single-buffers the
    constant-index weight blocks (worth it at real model sizes on v7x's 64 MiB VMEM).
    """
    wx0f, wxlf, whzr, whg, bhf, wyc, byc = (
        packed[k] for k in ("wx0", "wxl", "whzr", "whg", "bh", "wy", "by"))
    B, S, I = x_bsi.shape
    L, H = whg.shape[0], whg.shape[-1]
    O = wyc.shape[1]
    Lm1 = wxlf.shape[0]
    wdt = wx0f.dtype

    # Pad batch to a multiple of 8 (sublane tile) so every per-timestep row block,
    # slab access and store is tile-aligned.  Padded rows ride in sublanes the
    # VPU/MXU would pad anyway and are sliced off after the kernel.
    BP = -(-B // 8) * 8
    if hidden_state_blh is None:
        h0_lbh = jnp.zeros((L, BP, H), jnp.float32)
    else:
        hpad = hidden_state_blh.astype(jnp.float32)
        if BP != B:
            hpad = jnp.pad(hpad, ((0, BP - B), (0, 0), (0, 0)))
        h0_lbh = jnp.transpose(hpad, (1, 0, 2))                  # (L, BP, H)
    xpad = x_bsi
    if BP != B:
        xpad = jnp.pad(xpad, ((0, BP - B), (0, 0), (0, 0)))
    # Time-major, flattened (row s*BP + b), already in the MXU input dtype so the
    # per-chunk x DMA is half the bytes and needs no in-kernel cast.
    x2d = jnp.transpose(xpad, (1, 0, 2)).reshape(S * BP, I).astype(wdt)

    T = _pick_time_chunk(S, BP, max_time_chunk)
    SPB = _steps_per_body(T, BP, jnp.dtype(wdt).itemsize)

    kernel = functools.partial(_gru_kernel, n_layers=L, t_chunk=T, batch=BP,
                               h_dim=H, steps_per_body=SPB)

    def wspec(shape, index_map):
        # Constant-index blocks (weights / biases / h0): optionally single-buffered.
        if weight_buffer_count is None:
            return pl.BlockSpec(shape, index_map)
        return pl.BlockSpec(shape, index_map,
                            pipeline_mode=pl.Buffered(weight_buffer_count))

    in_specs = [
        pl.BlockSpec((T * BP, I), lambda s: (s, 0)),             # x, one time chunk
        wspec((L, BP, H), lambda s: (0, 0, 0)),                  # h0
        wspec((I, 3 * H), lambda s: (0, 0)),                     # fused W_x, layer 0
        wspec((Lm1, H, 3 * H), lambda s: (0, 0, 0)),             # fused W_x, layers 1..
        wspec((L, H, 2 * H), lambda s: (0, 0, 0)),               # fused W_h{z,r}
        wspec((L, H, H), lambda s: (0, 0, 0)),                   # W_hg
        wspec((L, 1, 3 * H), lambda s: (0, 0, 0)),               # fused biases
        wspec((H, O), lambda s: (0, 0)),                         # W_y
        wspec((1, O), lambda s: (0, 0)),                         # b_y
    ]
    out_specs = (
        pl.BlockSpec((T * BP, O), lambda s: (s, 0)),             # y, one time chunk
        pl.BlockSpec((L, BP, H), lambda s: (0, 0, 0)),           # resident hidden carry
    )
    scratch_shapes = [
        pltpu.VMEM((T * BP, 3 * H), jnp.float32),                # staged x0 projection
        pltpu.VMEM((T * BP, H), wdt),                            # staged last-layer h
    ]

    # Rough VMEM footprint: double-buffered sliding blocks + (optionally single-
    # buffered) resident weights + scratch.  Only raise the scoped-VMEM limit when
    # the conservative default would not fit (matters at real sizes, esp. v7x 64 MiB).
    wbuf = 2 if weight_buffer_count is None else weight_buffer_count
    const_blocks = [((L, BP, H), jnp.float32), ((I, 3 * H), wdt),
                    ((Lm1, H, 3 * H), wdt), ((L, H, 2 * H), wdt), ((L, H, H), wdt),
                    ((L, 1, 3 * H), jnp.float32), ((H, O), wdt), ((1, O), jnp.float32)]
    vmem_est = (2 * _block_vmem_bytes((T * BP, I), wdt)
                + 2 * _block_vmem_bytes((T * BP, O), jnp.float32)
                + 2 * _block_vmem_bytes((L, BP, H), jnp.float32)
                + wbuf * sum(_block_vmem_bytes(sh, dt) for sh, dt in const_blocks)
                + _block_vmem_bytes((T * BP, 3 * H), jnp.float32)
                + _block_vmem_bytes((T * BP, H), wdt)
                + (2 << 20))
    cp_kwargs = dict(dimension_semantics=("arbitrary",))
    if vmem_limit_bytes is None and vmem_est > (16 << 20):
        vmem_limit_bytes = vmem_est
    if vmem_limit_bytes is not None:
        cp_kwargs["vmem_limit_bytes"] = int(vmem_limit_bytes)

    y2d, h_lbh = pl.pallas_call(
        kernel,
        out_shape=(jax.ShapeDtypeStruct((S * BP, O), jnp.float32),
                   jax.ShapeDtypeStruct((L, BP, H), jnp.float32)),
        grid=(S // T,),
        in_specs=in_specs,
        out_specs=out_specs,
        scratch_shapes=scratch_shapes,
        compiler_params=pltpu.CompilerParams(**cp_kwargs),
    )(x2d, h0_lbh, wx0f, wxlf, whzr, whg, bhf, wyc, byc)

    # TODO(synk): for B >= 16 on v7x, add a leading "parallel" batch-chunk grid axis
    # (split x/y/h by batch chunk, replicate weights) so both TensorCores are used.
    y_bso = jnp.transpose(y2d.reshape(S, BP, O), (1, 0, 2))[:B]
    h_blh = jnp.transpose(h_lbh, (1, 0, 2))[:B]
    return y_bso, h_blh


# ------------------------------------------------------------------ reference + demo


def reference_forward(params, x_bsi, hidden_state_blh=None):
    """Pure-JAX f32 replica of the PyTorch forward, for verification."""
    wx0, wxl, wh, bh, wy, by = (params[k] for k in ("wx0", "wxl", "wh", "bh", "wy", "by"))
    B, S, I = x_bsi.shape
    L, _, H, _ = wh.shape
    if hidden_state_blh is None:
        hidden_state_blh = jnp.zeros((B, L, H), jnp.float32)
    hs = [hidden_state_blh[:, i, :] for i in range(L)]
    ys = []
    for s in range(S):
        for i in range(L):
            h = hs[i]
            if i == 0:
                xin, wz, wr, wg = x_bsi[:, s, :], wx0[0], wx0[1], wx0[2]
            else:
                xin, wz, wr, wg = hs[i - 1], wxl[i - 1, 0], wxl[i - 1, 1], wxl[i - 1, 2]
            z = jax.nn.sigmoid(xin @ wz + h @ wh[i, 0] + bh[i, 0])
            r = jax.nn.sigmoid(xin @ wr + h @ wh[i, 1] + bh[i, 1])
            g = jnp.tanh(xin @ wg + (r * h) @ wh[i, 2] + bh[i, 2])
            hs[i] = h * z + (1.0 - z) * g
        ys.append(hs[-1] @ wy + by)
    return jnp.stack(ys, axis=1), jnp.stack(hs, axis=1)


def init_params(key, in_dim, h_dim, out_dim, n_layers, scale=0.1):
    ks = jax.random.split(key, 6)
    lm1 = max(n_layers - 1, 1)
    return {
        "wx0": scale * jax.random.normal(ks[0], (3, in_dim, h_dim), jnp.float32),
        "wxl": scale * jax.random.normal(ks[1], (lm1, 3, h_dim, h_dim), jnp.float32),
        "wh":  scale * jax.random.normal(ks[2], (n_layers, 3, h_dim, h_dim), jnp.float32),
        "bh":  scale * jax.random.normal(ks[3], (n_layers, 3, 1, h_dim), jnp.float32),
        "wy":  scale * jax.random.normal(ks[4], (h_dim, out_dim), jnp.float32),
        "by":  scale * jax.random.normal(ks[5], (1, out_dim), jnp.float32),
    }


if __name__ == "__main__":
    B, S = 2, 16
    in_dim = out_dim = 16   # module requires out_dim == in_dim (writes into zeros_like(input))
    h_dim = 32              # NOTE: at real model sizes prefer H, O multiples of 128
    n_layers = 2

    key = jax.random.PRNGKey(0)
    k_par, k_x, k_h = jax.random.split(key, 3)
    params = init_params(k_par, in_dim, h_dim, out_dim, n_layers)
    x = jax.random.normal(k_x, (B, S, in_dim), jnp.float32)
    h0 = jax.random.normal(k_h, (B, n_layers, h_dim), jnp.float32)

    y_gold, h_gold = reference_forward(params, x, h0)

    # 1) Tight structural check: f32 weights, small chunks (grid=(4,), exercises the
    #    cross-chunk resident hidden carry).
    packed_f32 = prepare_params(params, weight_dtype=jnp.float32)
    y32, h32 = multilayer_gru_forward(packed_f32, x, h0, max_time_chunk=4)
    y32 = jax.block_until_ready(y32)
    h32 = jax.block_until_ready(h32)
    assert y32.shape == (B, S, out_dim) and h32.shape == (B, n_layers, h_dim)
    assert jnp.allclose(y32, y_gold, atol=1e-4, rtol=1e-4)
    assert jnp.allclose(h32, h_gold, atol=1e-4, rtol=1e-4)

    # 2) f32 weights, default chunking (single chunk, exercises the fori_loop +
    #    aligned dynamic slab path).
    y32b, h32b = multilayer_gru_forward(packed_f32, x, h0)
    y32b = jax.block_until_ready(y32b)
    h32b = jax.block_until_ready(h32b)
    assert jnp.allclose(y32b, y_gold, atol=1e-4, rtol=1e-4)
    assert jnp.allclose(h32b, h_gold, atol=1e-4, rtol=1e-4)

    # 3) Default perf mode: bf16 x / weights / yh staging, f32 accumulation + carry.
    packed_bf16 = prepare_params(params)
    y, h_fin = multilayer_gru_forward(packed_bf16, x, h0)
    y = jax.block_until_ready(y)
    h_fin = jax.block_until_ready(h_fin)
    assert y.shape == (B, S, out_dim) and h_fin.shape == (B, n_layers, h_dim)
    assert jnp.allclose(y, y_gold, atol=3e-2, rtol=3e-2)
    assert jnp.allclose(h_fin, h_gold, atol=3e-2, rtol=3e-2)

    print("KERNEL_OK")
</pallas_src>

<mosaic_0001>
module attributes {stable_mosaic.version = 11 : i64} {
  func.func @_gru_kernel(%arg0: i32, %arg1: memref<32x16xf32, #tpu.memory_space<vmem>>, %arg2: memref<2x8x32xf32, #tpu.memory_space<vmem>>, %arg3: memref<16x96xf32, #tpu.memory_space<vmem>>, %arg4: memref<1x32x96xf32, #tpu.memory_space<vmem>>, %arg5: memref<2x32x64xf32, #tpu.memory_space<vmem>>, %arg6: memref<2x32x32xf32, #tpu.memory_space<vmem>>, %arg7: memref<2x1x96xf32, #tpu.memory_space<vmem>>, %arg8: memref<32x16xf32, #tpu.memory_space<vmem>>, %arg9: memref<1x16xf32, #tpu.memory_space<vmem>>, %arg10: memref<32x16xf32, #tpu.memory_space<vmem>>, %arg11: memref<2x8x32xf32, #tpu.memory_space<vmem>>, %arg12: memref<32x96xf32, #tpu.memory_space<vmem>>, %arg13: memref<32x32xf32, #tpu.memory_space<vmem>>) attributes {dimension_semantics = [#tpu.dimension_semantics<arbitrary>], iteration_bounds = array<i64: 4>, scalar_prefetch = 0 : i64, scratch_operands = 2 : i64, tpu.core_type = #tpu.core_type<tc>, window_params = [{transform_indices = @transform_0, window_bounds = array<i64: 32, 16>}, {pipeline_mode = #tpu.pipeline_mode<synchronous>, transform_indices = @transform_1, window_bounds = array<i64: 2, 8, 32>}, {pipeline_mode = #tpu.pipeline_mode<synchronous>, transform_indices = @transform_2, window_bounds = array<i64: 16, 96>}, {pipeline_mode = #tpu.pipeline_mode<synchronous>, transform_indices = @transform_3, window_bounds = array<i64: 1, 32, 96>}, {pipeline_mode = #tpu.pipeline_mode<synchronous>, transform_indices = @transform_4, window_bounds = array<i64: 2, 32, 64>}, {pipeline_mode = #tpu.pipeline_mode<synchronous>, transform_indices = @transform_5, window_bounds = array<i64: 2, 32, 32>}, {pipeline_mode = #tpu.pipeline_mode<synchronous>, transform_indices = @transform_6, window_bounds = array<i64: 2, 1, 96>}, {pipeline_mode = #tpu.pipeline_mode<synchronous>, transform_indices = @transform_7, window_bounds = array<i64: 32, 16>}, {pipeline_mode = #tpu.pipeline_mode<synchronous>, transform_indices = @transform_8, window_bounds = array<i64: 1, 16>}, {transform_indices = @transform_9, window_bounds = array<i64: 32, 16>}, {pipeline_mode = #tpu.pipeline_mode<synchronous>, transform_indices = @transform_10, window_bounds = array<i64: 2, 8, 32>}]} {
    %c0_i32 = arith.constant 0 : i32
    %0 = arith.cmpi eq, %arg0, %c0_i32 : i32
    %1 = arith.extui %0 : i1 to i32
    %c0_i32_0 = arith.constant 0 : i32
    %2 = arith.cmpi ne, %1, %c0_i32_0 : i32
    scf.if %2 {
      %c0_129 = arith.constant 0 : index
      %c0_130 = arith.constant 0 : index
      %c0_131 = arith.constant 0 : index
      %268 = vector.load %arg2[%c0_129, %c0_130, %c0_131] : memref<2x8x32xf32, #tpu.memory_space<vmem>>, vector<2x8x32xf32>
      %c0_132 = arith.constant 0 : index
      %c0_133 = arith.constant 0 : index
      %c0_134 = arith.constant 0 : index
      %269 = vector.load %arg11[%c0_132, %c0_133, %c0_134] : memref<2x8x32xf32, #tpu.memory_space<vmem>>, vector<2x8x32xf32>
      tpu.vector_store %arg11[%c0_132, %c0_133, %c0_134], %268 {strides = array<i32>} : memref<2x8x32xf32, #tpu.memory_space<vmem>>, vector<2x8x32xf32>,
    } else {
    }
    %c0 = arith.constant 0 : index
    %c0_1 = arith.constant 0 : index
    %3 = vector.load %arg1[%c0, %c0_1] : memref<32x16xf32, #tpu.memory_space<vmem>>, vector<32x16xf32>
    %c0_2 = arith.constant 0 : index
    %c0_3 = arith.constant 0 : index
    %4 = vector.load %arg3[%c0_2, %c0_3] : memref<16x96xf32, #tpu.memory_space<vmem>>, vector<16x96xf32>
    %cst = arith.constant dense<0.000000e+00> : vector<32x96xf32>
    %5 = tpu.matmul %3, %4, %cst {dimension_numbers = #tpu.dot_dimension_numbers<[1], [0], [0], [1], [0, 0, 1, 1], [], []>} : vector<32x16xf32>, vector<16x96xf32>, vector<32x96xf32> -> vector<32x96xf32>
    %c0_4 = arith.constant 0 : index
    %c0_5 = arith.constant 0 : index
    %6 = vector.load %arg12[%c0_4, %c0_5] : memref<32x96xf32, #tpu.memory_space<vmem>>, vector<32x96xf32>
    tpu.vector_store %arg12[%c0_4, %c0_5], %5 {strides = array<i32>} : memref<32x96xf32, #tpu.memory_space<vmem>>, vector<32x96xf32>,
    %c0_6 = arith.constant 0 : index
    %c0_7 = arith.constant 0 : index
    %c0_8 = arith.constant 0 : index
    %7 = vector.load %arg7[%c0_6, %c0_7, %c0_8] : memref<2x1x96xf32, #tpu.memory_space<vmem>>, vector<2x1x96xf32>
    %8 = vector.extract_strided_slice %7 {offsets = [0, 0, 0], sizes = [1, 1, 64], strides = [1, 1, 1]} : vector<2x1x96xf32> to vector<1x1x64xf32>
    %9 = vector.shape_cast %8 : vector<1x1x64xf32> to vector<1x64xf32>
    %10 = vector.shape_cast %9 : vector<1x64xf32> to vector<1x64xf32>
    %11 = vector.broadcast %10 : vector<1x64xf32> to vector<8x64xf32>
    %12 = vector.extract_strided_slice %7 {offsets = [1, 0, 0], sizes = [1, 1, 64], strides = [1, 1, 1]} : vector<2x1x96xf32> to vector<1x1x64xf32>
    %13 = vector.shape_cast %12 : vector<1x1x64xf32> to vector<1x64xf32>
    %14 = vector.shape_cast %13 : vector<1x64xf32> to vector<1x64xf32>
    %15 = vector.broadcast %14 : vector<1x64xf32> to vector<8x64xf32>
    %16 = vector.extract_strided_slice %7 {offsets = [0, 0, 64], sizes = [1, 1, 32], strides = [1, 1, 1]} : vector<2x1x96xf32> to vector<1x1x32xf32>
    %17 = vector.shape_cast %16 : vector<1x1x32xf32> to vector<1x32xf32>
    %18 = vector.shape_cast %17 : vector<1x32xf32> to vector<1x32xf32>
    %19 = vector.broadcast %18 : vector<1x32xf32> to vector<8x32xf32>
    %20 = vector.extract_strided_slice %7 {offsets = [1, 0, 64], sizes = [1, 1, 32], strides = [1, 1, 1]} : vector<2x1x96xf32> to vector<1x1x32xf32>
    %21 = vector.shape_cast %20 : vector<1x1x32xf32> to vector<1x32xf32>
    %22 = vector.shape_cast %21 : vector<1x32xf32> to vector<1x32xf32>
    %23 = vector.broadcast %22 : vector<1x32xf32> to vector<8x32xf32>
    %c0_9 = arith.constant 0 : index
    %c0_10 = arith.constant 0 : index
    %c0_11 = arith.constant 0 : index
    %24 = vector.load %arg11[%c0_9, %c0_10, %c0_11] : memref<2x8x32xf32, #tpu.memory_space<vmem>>, vector<1x8x32xf32>
    %25 = vector.shape_cast %24 : vector<1x8x32xf32> to vector<8x32xf32>
    %c1 = arith.constant 1 : index
    %c0_12 = arith.constant 0 : index
    %c0_13 = arith.constant 0 : index
    %26 = vector.load %arg11[%c1, %c0_12, %c0_13] : memref<2x8x32xf32, #tpu.memory_space<vmem>>, vector<1x8x32xf32>
    %27 = vector.shape_cast %26 : vector<1x8x32xf32> to vector<8x32xf32>
    %c0_14 = arith.constant 0 : index
    %c0_15 = arith.constant 0 : index
    %28 = vector.load %arg12[%c0_14, %c0_15] : memref<32x96xf32, #tpu.memory_space<vmem>>, vector<32x96xf32>
    %29 = vector.extract_strided_slice %28 {offsets = [0, 0], sizes = [8, 96], strides = [1, 1]} : vector<32x96xf32> to vector<8x96xf32>
    %c0_16 = arith.constant 0 : index
    %c0_17 = arith.constant 0 : index
    %c0_18 = arith.constant 0 : index
    %30 = vector.load %arg5[%c0_16, %c0_17, %c0_18] : memref<2x32x64xf32, #tpu.memory_space<vmem>>, vector<1x32x64xf32>
    %31 = vector.shape_cast %30 : vector<1x32x64xf32> to vector<32x64xf32>
    %cst_19 = arith.constant dense<0.000000e+00> : vector<8x64xf32>
    %32 = tpu.matmul %25, %31, %cst_19 {dimension_numbers = #tpu.dot_dimension_numbers<[1], [0], [0], [1], [0, 0, 1, 1], [], []>} : vector<8x32xf32>, vector<32x64xf32>, vector<8x64xf32> -> vector<8x64xf32>
    %c1_20 = arith.constant 1 : index
    %c0_21 = arith.constant 0 : index
    %c0_22 = arith.constant 0 : index
    %33 = vector.load %arg5[%c1_20, %c0_21, %c0_22] : memref<2x32x64xf32, #tpu.memory_space<vmem>>, vector<1x32x64xf32>
    %34 = vector.shape_cast %33 : vector<1x32x64xf32> to vector<32x64xf32>
    %cst_23 = arith.constant dense<0.000000e+00> : vector<8x64xf32>
    %35 = tpu.matmul %27, %34, %cst_23 {dimension_numbers = #tpu.dot_dimension_numbers<[1], [0], [0], [1], [0, 0, 1, 1], [], []>} : vector<8x32xf32>, vector<32x64xf32>, vector<8x64xf32> -> vector<8x64xf32>
    %36 = vector.extract_strided_slice %29 {offsets = [0, 0], sizes = [8, 64], strides = [1, 1]} : vector<8x96xf32> to vector<8x64xf32>
    %37 = arith.addf %36, %32 : vector<8x64xf32>
    %38 = arith.addf %37, %11 : vector<8x64xf32>
    %39 = arith.negf %38 : vector<8x64xf32>
    %40 = math.exp %39 : vector<8x64xf32>
    %cst_24 = arith.constant 1.000000e+00 : f32
    %41 = vector.broadcast %cst_24 : f32 to vector<8x64xf32>
    %42 = arith.addf %41, %40 : vector<8x64xf32>
    %43 = arith.divf %41, %42 : vector<8x64xf32>
    %44 = vector.extract_strided_slice %43 {offsets = [0, 0], sizes = [8, 32], strides = [1, 1]} : vector<8x64xf32> to vector<8x32xf32>
    %45 = vector.extract_strided_slice %43 {offsets = [0, 32], sizes = [8, 32], strides = [1, 1]} : vector<8x64xf32> to vector<8x32xf32>
    %46 = vector.extract_strided_slice %29 {offsets = [0, 64], sizes = [8, 32], strides = [1, 1]} : vector<8x96xf32> to vector<8x32xf32>
    %47 = arith.mulf %45, %25 : vector<8x32xf32>
    %c0_25 = arith.constant 0 : index
    %c0_26 = arith.constant 0 : index
    %c0_27 = arith.constant 0 : index
    %48 = vector.load %arg6[%c0_25, %c0_26, %c0_27] : memref<2x32x32xf32, #tpu.memory_space<vmem>>, vector<1x32x32xf32>
    %49 = vector.shape_cast %48 : vector<1x32x32xf32> to vector<32x32xf32>
    %cst_28 = arith.constant dense<0.000000e+00> : vector<8x32xf32>
    %50 = tpu.matmul %47, %49, %cst_28 {dimension_numbers = #tpu.dot_dimension_numbers<[1], [0], [0], [1], [0, 0, 1, 1], [], []>} : vector<8x32xf32>, vector<32x32xf32>, vector<8x32xf32> -> vector<8x32xf32>
    %51 = arith.addf %46, %50 : vector<8x32xf32>
    %52 = arith.addf %51, %19 : vector<8x32xf32>
    %53 = math.tanh %52 : vector<8x32xf32>
    %54 = arith.mulf %25, %44 : vector<8x32xf32>
    %cst_29 = arith.constant 1.000000e+00 : f32
    %55 = vector.broadcast %cst_29 : f32 to vector<8x32xf32>
    %56 = arith.subf %55, %44 : vector<8x32xf32>
    %57 = arith.mulf %56, %53 : vector<8x32xf32>
    %58 = arith.addf %54, %57 : vector<8x32xf32>
    %c0_30 = arith.constant 0 : index
    %c0_31 = arith.constant 0 : index
    %c0_32 = arith.constant 0 : index
    %59 = vector.load %arg4[%c0_30, %c0_31, %c0_32] : memref<1x32x96xf32, #tpu.memory_space<vmem>>, vector<1x32x96xf32>
    %60 = vector.shape_cast %59 : vector<1x32x96xf32> to vector<32x96xf32>
    %cst_33 = arith.constant dense<0.000000e+00> : vector<8x96xf32>
    %61 = tpu.matmul %58, %60, %cst_33 {dimension_numbers = #tpu.dot_dimension_numbers<[1], [0], [0], [1], [0, 0, 1, 1], [], []>} : vector<8x32xf32>, vector<32x96xf32>, vector<8x96xf32> -> vector<8x96xf32>
    %62 = vector.extract_strided_slice %61 {offsets = [0, 0], sizes = [8, 64], strides = [1, 1]} : vector<8x96xf32> to vector<8x64xf32>
    %63 = arith.addf %62, %35 : vector<8x64xf32>
    %64 = arith.addf %63, %15 : vector<8x64xf32>
    %65 = arith.negf %64 : vector<8x64xf32>
    %66 = math.exp %65 : vector<8x64xf32>
    %cst_34 = arith.constant 1.000000e+00 : f32
    %67 = vector.broadcast %cst_34 : f32 to vector<8x64xf32>
    %68 = arith.addf %67, %66 : vector<8x64xf32>
    %69 = arith.divf %67, %68 : vector<8x64xf32>
    %70 = vector.extract_strided_slice %69 {offsets = [0, 0], sizes = [8, 32], strides = [1, 1]} : vector<8x64xf32> to vector<8x32xf32>
    %71 = vector.extract_strided_slice %69 {offsets = [0, 32], sizes = [8, 32], strides = [1, 1]} : vector<8x64xf32> to vector<8x32xf32>
    %72 = vector.extract_strided_slice %61 {offsets = [0, 64], sizes = [8, 32], strides = [1, 1]} : vector<8x96xf32> to vector<8x32xf32>
    %73 = arith.mulf %71, %27 : vector<8x32xf32>
    %c1_35 = arith.constant 1 : index
    %c0_36 = arith.constant 0 : index
    %c0_37 = arith.constant 0 : index
    %74 = vector.load %arg6[%c1_35, %c0_36, %c0_37] : memref<2x32x32xf32, #tpu.memory_space<vmem>>, vector<1x32x32xf32>
    %75 = vector.shape_cast %74 : vector<1x32x32xf32> to vector<32x32xf32>
    %cst_38 = arith.constant dense<0.000000e+00> : vector<8x32xf32>
    %76 = tpu.matmul %73, %75, %cst_38 {dimension_numbers = #tpu.dot_dimension_numbers<[1], [0], [0], [1], [0, 0, 1, 1], [], []>} : vector<8x32xf32>, vector<32x32xf32>, vector<8x32xf32> -> vector<8x32xf32>
    %77 = arith.addf %72, %76 : vector<8x32xf32>
    %78 = arith.addf %77, %23 : vector<8x32xf32>
    %79 = math.tanh %78 : vector<8x32xf32>
    %80 = arith.mulf %27, %70 : vector<8x32xf32>
    %cst_39 = arith.constant 1.000000e+00 : f32
    %81 = vector.broadcast %cst_39 : f32 to vector<8x32xf32>
    %82 = arith.subf %81, %70 : vector<8x32xf32>
    %83 = arith.mulf %82, %79 : vector<8x32xf32>
    %84 = arith.addf %80, %83 : vector<8x32xf32>
    %85 = vector.extract_strided_slice %28 {offsets = [8, 0], sizes = [8, 96], strides = [1, 1]} : vector<32x96xf32> to vector<8x96xf32>
    %c0_40 = arith.constant 0 : index
    %c0_41 = arith.constant 0 : index
    %c0_42 = arith.constant 0 : index
    %86 = vector.load %arg5[%c0_40, %c0_41, %c0_42] : memref<2x32x64xf32, #tpu.memory_space<vmem>>, vector<1x32x64xf32>
    %87 = vector.shape_cast %86 : vector<1x32x64xf32> to vector<32x64xf32>
    %cst_43 = arith.constant dense<0.000000e+00> : vector<8x64xf32>
    %88 = tpu.matmul %58, %87, %cst_43 {dimension_numbers = #tpu.dot_dimension_numbers<[1], [0], [0], [1], [0, 0, 1, 1], [], []>} : vector<8x32xf32>, vector<32x64xf32>, vector<8x64xf32> -> vector<8x64xf32>
    %c1_44 = arith.constant 1 : index
    %c0_45 = arith.constant 0 : index
    %c0_46 = arith.constant 0 : index
    %89 = vector.load %arg5[%c1_44, %c0_45, %c0_46] : memref<2x32x64xf32, #tpu.memory_space<vmem>>, vector<1x32x64xf32>
    %90 = vector.shape_cast %89 : vector<1x32x64xf32> to vector<32x64xf32>
    %cst_47 = arith.constant dense<0.000000e+00> : vector<8x64xf32>
    %91 = tpu.matmul %84, %90, %cst_47 {dimension_numbers = #tpu.dot_dimension_numbers<[1], [0], [0], [1], [0, 0, 1, 1], [], []>} : vector<8x32xf32>, vector<32x64xf32>, vector<8x64xf32> -> vector<8x64xf32>
    %92 = vector.extract_strided_slice %85 {offsets = [0, 0], sizes = [8, 64], strides = [1, 1]} : vector<8x96xf32> to vector<8x64xf32>
    %93 = arith.addf %92, %88 : vector<8x64xf32>
    %94 = arith.addf %93, %11 : vector<8x64xf32>
    %95 = arith.negf %94 : vector<8x64xf32>
    %96 = math.exp %95 : vector<8x64xf32>
    %cst_48 = arith.constant 1.000000e+00 : f32
    %97 = vector.broadcast %cst_48 : f32 to vector<8x64xf32>
    %98 = arith.addf %97, %96 : vector<8x64xf32>
    %99 = arith.divf %97, %98 : vector<8x64xf32>
    %100 = vector.extract_strided_slice %99 {offsets = [0, 0], sizes = [8, 32], strides = [1, 1]} : vector<8x64xf32> to vector<8x32xf32>
    %101 = vector.extract_strided_slice %99 {offsets = [0, 32], sizes = [8, 32], strides = [1, 1]} : vector<8x64xf32> to vector<8x32xf32>
    %102 = vector.extract_strided_slice %85 {offsets = [0, 64], sizes = [8, 32], strides = [1, 1]} : vector<8x96xf32> to vector<8x32xf32>
    %103 = arith.mulf %101, %58 : vector<8x32xf32>
    %c0_49 = arith.constant 0 : index
    %c0_50 = arith.constant 0 : index
    %c0_51 = arith.constant 0 : index
    %104 = vector.load %arg6[%c0_49, %c0_50, %c0_51] : memref<2x32x32xf32, #tpu.memory_space<vmem>>, vector<1x32x32xf32>
    %105 = vector.shape_cast %104 : vector<1x32x32xf32> to vector<32x32xf32>
    %cst_52 = arith.constant dense<0.000000e+00> : vector<8x32xf32>
    %106 = tpu.matmul %103, %105, %cst_52 {dimension_numbers = #tpu.dot_dimension_numbers<[1], [0], [0], [1], [0, 0, 1, 1], [], []>} : vector<8x32xf32>, vector<32x32xf32>, vector<8x32xf32> -> vector<8x32xf32>
    %107 = arith.addf %102, %106 : vector<8x32xf32>
    %108 = arith.addf %107, %19 : vector<8x32xf32>
    %109 = math.tanh %108 : vector<8x32xf32>
    %110 = arith.mulf %58, %100 : vector<8x32xf32>
    %cst_53 = arith.constant 1.000000e+00 : f32
    %111 = vector.broadcast %cst_53 : f32 to vector<8x32xf32>
    %112 = arith.subf %111, %100 : vector<8x32xf32>
    %113 = arith.mulf %112, %109 : vector<8x32xf32>
    %114 = arith.addf %110, %113 : vector<8x32xf32>
    %c0_54 = arith.constant 0 : index
    %c0_55 = arith.constant 0 : index
    %c0_56 = arith.constant 0 : index
    %115 = vector.load %arg4[%c0_54, %c0_55, %c0_56] : memref<1x32x96xf32, #tpu.memory_space<vmem>>, vector<1x32x96xf32>
    %116 = vector.shape_cast %115 : vector<1x32x96xf32> to vector<32x96xf32>
    %cst_57 = arith.constant dense<0.000000e+00> : vector<8x96xf32>
    %117 = tpu.matmul %114, %116, %cst_57 {dimension_numbers = #tpu.dot_dimension_numbers<[1], [0], [0], [1], [0, 0, 1, 1], [], []>} : vector<8x32xf32>, vector<32x96xf32>, vector<8x96xf32> -> vector<8x96xf32>
    %118 = vector.extract_strided_slice %117 {offsets = [0, 0], sizes = [8, 64], strides = [1, 1]} : vector<8x96xf32> to vector<8x64xf32>
    %119 = arith.addf %118, %91 : vector<8x64xf32>
    %120 = arith.addf %119, %15 : vector<8x64xf32>
    %121 = arith.negf %120 : vector<8x64xf32>
    %122 = math.exp %121 : vector<8x64xf32>
    %cst_58 = arith.constant 1.000000e+00 : f32
    %123 = vector.broadcast %cst_58 : f32 to vector<8x64xf32>
    %124 = arith.addf %123, %122 : vector<8x64xf32>
    %125 = arith.divf %123, %124 : vector<8x64xf32>
    %126 = vector.extract_strided_slice %125 {offsets = [0, 0], sizes = [8, 32], strides = [1, 1]} : vector<8x64xf32> to vector<8x32xf32>
    %127 = vector.extract_strided_slice %125 {offsets = [0, 32], sizes = [8, 32], strides = [1, 1]} : vector<8x64xf32> to vector<8x32xf32>
    %128 = vector.extract_strided_slice %117 {offsets = [0, 64], sizes = [8, 32], strides = [1, 1]} : vector<8x96xf32> to vector<8x32xf32>
    %129 = arith.mulf %127, %84 : vector<8x32xf32>
    %c1_59 = arith.constant 1 : index
    %c0_60 = arith.constant 0 : index
    %c0_61 = arith.constant 0 : index
    %130 = vector.load %arg6[%c1_59, %c0_60, %c0_61] : memref<2x32x32xf32, #tpu.memory_space<vmem>>, vector<1x32x32xf32>
    %131 = vector.shape_cast %130 : vector<1x32x32xf32> to vector<32x32xf32>
    %cst_62 = arith.constant dense<0.000000e+00> : vector<8x32xf32>
    %132 = tpu.matmul %129, %131, %cst_62 {dimension_numbers = #tpu.dot_dimension_numbers<[1], [0], [0], [1], [0, 0, 1, 1], [], []>} : vector<8x32xf32>, vector<32x32xf32>, vector<8x32xf32> -> vector<8x32xf32>
    %133 = arith.addf %128, %132 : vector<8x32xf32>
    %134 = arith.addf %133, %23 : vector<8x32xf32>
    %135 = math.tanh %134 : vector<8x32xf32>
    %136 = arith.mulf %84, %126 : vector<8x32xf32>
    %cst_63 = arith.constant 1.000000e+00 : f32
    %137 = vector.broadcast %cst_63 : f32 to vector<8x32xf32>
    %138 = arith.subf %137, %126 : vector<8x32xf32>
    %139 = arith.mulf %138, %135 : vector<8x32xf32>
    %140 = arith.addf %136, %139 : vector<8x32xf32>
    %141 = vector.extract_strided_slice %28 {offsets = [16, 0], sizes = [8, 96], strides = [1, 1]} : vector<32x96xf32> to vector<8x96xf32>
    %c0_64 = arith.constant 0 : index
    %c0_65 = arith.constant 0 : index
    %c0_66 = arith.constant 0 : index
    %142 = vector.load %arg5[%c0_64, %c0_65, %c0_66] : memref<2x32x64xf32, #tpu.memory_space<vmem>>, vector<1x32x64xf32>
    %143 = vector.shape_cast %142 : vector<1x32x64xf32> to vector<32x64xf32>
    %cst_67 = arith.constant dense<0.000000e+00> : vector<8x64xf32>
    %144 = tpu.matmul %114, %143, %cst_67 {dimension_numbers = #tpu.dot_dimension_numbers<[1], [0], [0], [1], [0, 0, 1, 1], [], []>} : vector<8x32xf32>, vector<32x64xf32>, vector<8x64xf32> -> vector<8x64xf32>
    %c1_68 = arith.constant 1 : index
    %c0_69 = arith.constant 0 : index
    %c0_70 = arith.constant 0 : index
    %145 = vector.load %arg5[%c1_68, %c0_69, %c0_70] : memref<2x32x64xf32, #tpu.memory_space<vmem>>, vector<1x32x64xf32>
    %146 = vector.shape_cast %145 : vector<1x32x64xf32> to vector<32x64xf32>
    %cst_71 = arith.constant dense<0.000000e+00> : vector<8x64xf32>
    %147 = tpu.matmul %140, %146, %cst_71 {dimension_numbers = #tpu.dot_dimension_numbers<[1], [0], [0], [1], [0, 0, 1, 1], [], []>} : vector<8x32xf32>, vector<32x64xf32>, vector<8x64xf32> -> vector<8x64xf32>
    %148 = vector.extract_strided_slice %141 {offsets = [0, 0], sizes = [8, 64], strides = [1, 1]} : vector<8x96xf32> to vector<8x64xf32>
    %149 = arith.addf %148, %144 : vector<8x64xf32>
    %150 = arith.addf %149, %11 : vector<8x64xf32>
    %151 = arith.negf %150 : vector<8x64xf32>
    %152 = math.exp %151 : vector<8x64xf32>
    %cst_72 = arith.constant 1.000000e+00 : f32
    %153 = vector.broadcast %cst_72 : f32 to vector<8x64xf32>
    %154 = arith.addf %153, %152 : vector<8x64xf32>
    %155 = arith.divf %153, %154 : vector<8x64xf32>
    %156 = vector.extract_strided_slice %155 {offsets = [0, 0], sizes = [8, 32], strides = [1, 1]} : vector<8x64xf32> to vector<8x32xf32>
    %157 = vector.extract_strided_slice %155 {offsets = [0, 32], sizes = [8, 32], strides = [1, 1]} : vector<8x64xf32> to vector<8x32xf32>
    %158 = vector.extract_strided_slice %141 {offsets = [0, 64], sizes = [8, 32], strides = [1, 1]} : vector<8x96xf32> to vector<8x32xf32>
    %159 = arith.mulf %157, %114 : vector<8x32xf32>
    %c0_73 = arith.constant 0 : index
    %c0_74 = arith.constant 0 : index
    %c0_75 = arith.constant 0 : index
    %160 = vector.load %arg6[%c0_73, %c0_74, %c0_75] : memref<2x32x32xf32, #tpu.memory_space<vmem>>, vector<1x32x32xf32>
    %161 = vector.shape_cast %160 : vector<1x32x32xf32> to vector<32x32xf32>
    %cst_76 = arith.constant dense<0.000000e+00> : vector<8x32xf32>
    %162 = tpu.matmul %159, %161, %cst_76 {dimension_numbers = #tpu.dot_dimension_numbers<[1], [0], [0], [1], [0, 0, 1, 1], [], []>} : vector<8x32xf32>, vector<32x32xf32>, vector<8x32xf32> -> vector<8x32xf32>
    %163 = arith.addf %158, %162 : vector<8x32xf32>
    %164 = arith.addf %163, %19 : vector<8x32xf32>
    %165 = math.tanh %164 : vector<8x32xf32>
    %166 = arith.mulf %114, %156 : vector<8x32xf32>
    %cst_77 = arith.constant 1.000000e+00 : f32
    %167 = vector.broadcast %cst_77 : f32 to vector<8x32xf32>
    %168 = arith.subf %167, %156 : vector<8x32xf32>
    %169 = arith.mulf %168, %165 : vector<8x32xf32>
    %170 = arith.addf %166, %169 : vector<8x32xf32>
    %c0_78 = arith.constant 0 : index
    %c0_79 = arith.constant 0 : index
    %c0_80 = arith.constant 0 : index
    %171 = vector.load %arg4[%c0_78, %c0_79, %c0_80] : memref<1x32x96xf32, #tpu.memory_space<vmem>>, vector<1x32x96xf32>
    %172 = vector.shape_cast %171 : vector<1x32x96xf32> to vector<32x96xf32>
    %cst_81 = arith.constant dense<0.000000e+00> : vector<8x96xf32>
    %173 = tpu.matmul %170, %172, %cst_81 {dimension_numbers = #tpu.dot_dimension_numbers<[1], [0], [0], [1], [0, 0, 1, 1], [], []>} : vector<8x32xf32>, vector<32x96xf32>, vector<8x96xf32> -> vector<8x96xf32>
    %174 = vector.extract_strided_slice %173 {offsets = [0, 0], sizes = [8, 64], strides = [1, 1]} : vector<8x96xf32> to vector<8x64xf32>
    %175 = arith.addf %174, %147 : vector<8x64xf32>
    %176 = arith.addf %175, %15 : vector<8x64xf32>
    %177 = arith.negf %176 : vector<8x64xf32>
    %178 = math.exp %177 : vector<8x64xf32>
    %cst_82 = arith.constant 1.000000e+00 : f32
    %179 = vector.broadcast %cst_82 : f32 to vector<8x64xf32>
    %180 = arith.addf %179, %178 : vector<8x64xf32>
    %181 = arith.divf %179, %180 : vector<8x64xf32>
    %182 = vector.extract_strided_slice %181 {offsets = [0, 0], sizes = [8, 32], strides = [1, 1]} : vector<8x64xf32> to vector<8x32xf32>
    %183 = vector.extract_strided_slice %181 {offsets = [0, 32], sizes = [8, 32], strides = [1, 1]} : vector<8x64xf32> to vector<8x32xf32>
    %184 = vector.extract_strided_slice %173 {offsets = [0, 64], sizes = [8, 32], strides = [1, 1]} : vector<8x96xf32> to vector<8x32xf32>
    %185 = arith.mulf %183, %140 : vector<8x32xf32>
    %c1_83 = arith.constant 1 : index
    %c0_84 = arith.constant 0 : index
    %c0_85 = arith.constant 0 : index
    %186 = vector.load %arg6[%c1_83, %c0_84, %c0_85] : memref<2x32x32xf32, #tpu.memory_space<vmem>>, vector<1x32x32xf32>
    %187 = vector.shape_cast %186 : vector<1x32x32xf32> to vector<32x32xf32>
    %cst_86 = arith.constant dense<0.000000e+00> : vector<8x32xf32>
    %188 = tpu.matmul %185, %187, %cst_86 {dimension_numbers = #tpu.dot_dimension_numbers<[1], [0], [0], [1], [0, 0, 1, 1], [], []>} : vector<8x32xf32>, vector<32x32xf32>, vector<8x32xf32> -> vector<8x32xf32>
    %189 = arith.addf %184, %188 : vector<8x32xf32>
    %190 = arith.addf %189, %23 : vector<8x32xf32>
    %191 = math.tanh %190 : vector<8x32xf32>
    %192 = arith.mulf %140, %182 : vector<8x32xf32>
    %cst_87 = arith.constant 1.000000e+00 : f32
    %193 = vector.broadcast %cst_87 : f32 to vector<8x32xf32>
    %194 = arith.subf %193, %182 : vector<8x32xf32>
    %195 = arith.mulf %194, %191 : vector<8x32xf32>
    %196 = arith.addf %192, %195 : vector<8x32xf32>
    %197 = vector.extract_strided_slice %28 {offsets = [24, 0], sizes = [8, 96], strides = [1, 1]} : vector<32x96xf32> to vector<8x96xf32>
    %c0_88 = arith.constant 0 : index
    %c0_89 = arith.constant 0 : index
    %c0_90 = arith.constant 0 : index
    %198 = vector.load %arg5[%c0_88, %c0_89, %c0_90] : memref<2x32x64xf32, #tpu.memory_space<vmem>>, vector<1x32x64xf32>
    %199 = vector.shape_cast %198 : vector<1x32x64xf32> to vector<32x64xf32>
    %cst_91 = arith.constant dense<0.000000e+00> : vector<8x64xf32>
    %200 = tpu.matmul %170, %199, %cst_91 {dimension_numbers = #tpu.dot_dimension_numbers<[1], [0], [0], [1], [0, 0, 1, 1], [], []>} : vector<8x32xf32>, vector<32x64xf32>, vector<8x64xf32> -> vector<8x64xf32>
    %c1_92 = arith.constant 1 : index
    %c0_93 = arith.constant 0 : index
    %c0_94 = arith.constant 0 : index
    %201 = vector.load %arg5[%c1_92, %c0_93, %c0_94] : memref<2x32x64xf32, #tpu.memory_space<vmem>>, vector<1x32x64xf32>
    %202 = vector.shape_cast %201 : vector<1x32x64xf32> to vector<32x64xf32>
    %cst_95 = arith.constant dense<0.000000e+00> : vector<8x64xf32>
    %203 = tpu.matmul %196, %202, %cst_95 {dimension_numbers = #tpu.dot_dimension_numbers<[1], [0], [0], [1], [0, 0, 1, 1], [], []>} : vector<8x32xf32>, vector<32x64xf32>, vector<8x64xf32> -> vector<8x64xf32>
    %204 = vector.extract_strided_slice %197 {offsets = [0, 0], sizes = [8, 64], strides = [1, 1]} : vector<8x96xf32> to vector<8x64xf32>
    %205 = arith.addf %204, %200 : vector<8x64xf32>
    %206 = arith.addf %205, %11 : vector<8x64xf32>
    %207 = arith.negf %206 : vector<8x64xf32>
    %208 = math.exp %207 : vector<8x64xf32>
    %cst_96 = arith.constant 1.000000e+00 : f32
    %209 = vector.broadcast %cst_96 : f32 to vector<8x64xf32>
    %210 = arith.addf %209, %208 : vector<8x64xf32>
    %211 = arith.divf %209, %210 : vector<8x64xf32>
    %212 = vector.extract_strided_slice %211 {offsets = [0, 0], sizes = [8, 32], strides = [1, 1]} : vector<8x64xf32> to vector<8x32xf32>
    %213 = vector.extract_strided_slice %211 {offsets = [0, 32], sizes = [8, 32], strides = [1, 1]} : vector<8x64xf32> to vector<8x32xf32>
    %214 = vector.extract_strided_slice %197 {offsets = [0, 64], sizes = [8, 32], strides = [1, 1]} : vector<8x96xf32> to vector<8x32xf32>
    %215 = arith.mulf %213, %170 : vector<8x32xf32>
    %c0_97 = arith.constant 0 : index
    %c0_98 = arith.constant 0 : index
    %c0_99 = arith.constant 0 : index
    %216 = vector.load %arg6[%c0_97, %c0_98, %c0_99] : memref<2x32x32xf32, #tpu.memory_space<vmem>>, vector<1x32x32xf32>
    %217 = vector.shape_cast %216 : vector<1x32x32xf32> to vector<32x32xf32>
    %cst_100 = arith.constant dense<0.000000e+00> : vector<8x32xf32>
    %218 = tpu.matmul %215, %217, %cst_100 {dimension_numbers = #tpu.dot_dimension_numbers<[1], [0], [0], [1], [0, 0, 1, 1], [], []>} : vector<8x32xf32>, vector<32x32xf32>, vector<8x32xf32> -> vector<8x32xf32>
    %219 = arith.addf %214, %218 : vector<8x32xf32>
    %220 = arith.addf %219, %19 : vector<8x32xf32>
    %221 = math.tanh %220 : vector<8x32xf32>
    %222 = arith.mulf %170, %212 : vector<8x32xf32>
    %cst_101 = arith.constant 1.000000e+00 : f32
    %223 = vector.broadcast %cst_101 : f32 to vector<8x32xf32>
    %224 = arith.subf %223, %212 : vector<8x32xf32>
    %225 = arith.mulf %224, %221 : vector<8x32xf32>
    %226 = arith.addf %222, %225 : vector<8x32xf32>
    %c0_102 = arith.constant 0 : index
    %c0_103 = arith.constant 0 : index
    %c0_104 = arith.constant 0 : index
    %227 = vector.load %arg4[%c0_102, %c0_103, %c0_104] : memref<1x32x96xf32, #tpu.memory_space<vmem>>, vector<1x32x96xf32>
    %228 = vector.shape_cast %227 : vector<1x32x96xf32> to vector<32x96xf32>
    %cst_105 = arith.constant dense<0.000000e+00> : vector<8x96xf32>
    %229 = tpu.matmul %226, %228, %cst_105 {dimension_numbers = #tpu.dot_dimension_numbers<[1], [0], [0], [1], [0, 0, 1, 1], [], []>} : vector<8x32xf32>, vector<32x96xf32>, vector<8x96xf32> -> vector<8x96xf32>
    %230 = vector.extract_strided_slice %229 {offsets = [0, 0], sizes = [8, 64], strides = [1, 1]} : vector<8x96xf32> to vector<8x64xf32>
    %231 = arith.addf %230, %203 : vector<8x64xf32>
    %232 = arith.addf %231, %15 : vector<8x64xf32>
    %233 = arith.negf %232 : vector<8x64xf32>
    %234 = math.exp %233 : vector<8x64xf32>
    %cst_106 = arith.constant 1.000000e+00 : f32
    %235 = vector.broadcast %cst_106 : f32 to vector<8x64xf32>
    %236 = arith.addf %235, %234 : vector<8x64xf32>
    %237 = arith.divf %235, %236 : vector<8x64xf32>
    %238 = vector.extract_strided_slice %237 {offsets = [0, 0], sizes = [8, 32], strides = [1, 1]} : vector<8x64xf32> to vector<8x32xf32>
    %239 = vector.extract_strided_slice %237 {offsets = [0, 32], sizes = [8, 32], strides = [1, 1]} : vector<8x64xf32> to vector<8x32xf32>
    %240 = vector.extract_strided_slice %229 {offsets = [0, 64], sizes = [8, 32], strides = [1, 1]} : vector<8x96xf32> to vector<8x32xf32>
    %241 = arith.mulf %239, %196 : vector<8x32xf32>
    %c1_107 = arith.constant 1 : index
    %c0_108 = arith.constant 0 : index
    %c0_109 = arith.constant 0 : index
    %242 = vector.load %arg6[%c1_107, %c0_108, %c0_109] : memref<2x32x32xf32, #tpu.memory_space<vmem>>, vector<1x32x32xf32>
    %243 = vector.shape_cast %242 : vector<1x32x32xf32> to vector<32x32xf32>
    %cst_110 = arith.constant dense<0.000000e+00> : vector<8x32xf32>
    %244 = tpu.matmul %241, %243, %cst_110 {dimension_numbers = #tpu.dot_dimension_numbers<[1], [0], [0], [1], [0, 0, 1, 1], [], []>} : vector<8x32xf32>, vector<32x32xf32>, vector<8x32xf32> -> vector<8x32xf32>
    %245 = arith.addf %240, %244 : vector<8x32xf32>
    %246 = arith.addf %245, %23 : vector<8x32xf32>
    %247 = math.tanh %246 : vector<8x32xf32>
    %248 = arith.mulf %196, %238 : vector<8x32xf32>
    %cst_111 = arith.constant 1.000000e+00 : f32
    %249 = vector.broadcast %cst_111 : f32 to vector<8x32xf32>
    %250 = arith.subf %249, %238 : vector<8x32xf32>
    %251 = arith.mulf %250, %247 : vector<8x32xf32>
    %252 = arith.addf %248, %251 : vector<8x32xf32>
    %253 = tpu.concatenate %84, %140, %196, %252 in 0 : vector<8x32xf32>, vector<8x32xf32>, vector<8x32xf32>, vector<8x32xf32> -> vector<32x32xf32>
    %c0_112 = arith.constant 0 : index
    %c0_113 = arith.constant 0 : index
    %254 = vector.load %arg13[%c0_112, %c0_113] : memref<32x32xf32, #tpu.memory_space<vmem>>, vector<32x32xf32>
    tpu.vector_store %arg13[%c0_112, %c0_113], %253 {strides = array<i32>} : memref<32x32xf32, #tpu.memory_space<vmem>>, vector<32x32xf32>,
    %c0_114 = arith.constant 0 : index
    %c0_115 = arith.constant 0 : index
    %c0_116 = arith.constant 0 : index
    %255 = vector.load %arg11[%c0_114, %c0_115, %c0_116] : memref<2x8x32xf32, #tpu.memory_space<vmem>>, vector<1x8x32xf32>
    %256 = vector.shape_cast %255 : vector<1x8x32xf32> to vector<8x32xf32>
    %257 = vector.shape_cast %226 : vector<8x32xf32> to vector<1x8x32xf32>
    tpu.vector_store %arg11[%c0_114, %c0_115, %c0_116], %257 {strides = array<i32>} : memref<2x8x32xf32, #tpu.memory_space<vmem>>, vector<1x8x32xf32>,
    %c1_117 = arith.constant 1 : index
    %c0_118 = arith.constant 0 : index
    %c0_119 = arith.constant 0 : index
    %258 = vector.load %arg11[%c1_117, %c0_118, %c0_119] : memref<2x8x32xf32, #tpu.memory_space<vmem>>, vector<1x8x32xf32>
    %259 = vector.shape_cast %258 : vector<1x8x32xf32> to vector<8x32xf32>
    %260 = vector.shape_cast %252 : vector<8x32xf32> to vector<1x8x32xf32>
    tpu.vector_store %arg11[%c1_117, %c0_118, %c0_119], %260 {strides = array<i32>} : memref<2x8x32xf32, #tpu.memory_space<vmem>>, vector<1x8x32xf32>,
    %c0_120 = arith.constant 0 : index
    %c0_121 = arith.constant 0 : index
    %261 = vector.load %arg13[%c0_120, %c0_121] : memref<32x32xf32, #tpu.memory_space<vmem>>, vector<32x32xf32>
    %c0_122 = arith.constant 0 : index
    %c0_123 = arith.constant 0 : index
    %262 = vector.load %arg8[%c0_122, %c0_123] : memref<32x16xf32, #tpu.memory_space<vmem>>, vector<32x16xf32>
    %cst_124 = arith.constant dense<0.000000e+00> : vector<32x16xf32>
    %263 = tpu.matmul %261, %262, %cst_124 {dimension_numbers = #tpu.dot_dimension_numbers<[1], [0], [0], [1], [0, 0, 1, 1], [], []>} : vector<32x32xf32>, vector<32x16xf32>, vector<32x16xf32> -> vector<32x16xf32>
    %c0_125 = arith.constant 0 : index
    %c0_126 = arith.constant 0 : index
    %264 = vector.load %arg9[%c0_125, %c0_126] : memref<1x16xf32, #tpu.memory_space<vmem>>, vector<1x16xf32>
    %265 = vector.broadcast %264 : vector<1x16xf32> to vector<32x16xf32>
    %266 = arith.addf %263, %265 : vector<32x16xf32>
    %c0_127 = arith.constant 0 : index
    %c0_128 = arith.constant 0 : index
    %267 = vector.load %arg10[%c0_127, %c0_128] : memref<32x16xf32, #tpu.memory_space<vmem>>, vector<32x16xf32>
    tpu.vector_store %arg10[%c0_127, %c0_128], %266 {strides = array<i32>} : memref<32x16xf32, #tpu.memory_space<vmem>>, vector<32x16xf32>,
    return
  }
  func.func @transform_0(%arg0: i32) -> (i32, i32) {
    %c0_i32 = arith.constant 0 : i32
    %c0_i32_0 = arith.constant 0 : i32
    return %arg0, %c0_i32 : i32, i32
  }
  func.func @transform_1(%arg0: i32) -> (i32, i32, i32) {
    %c0_i32 = arith.constant 0 : i32
    %c0_i32_0 = arith.constant 0 : i32
    %c0_i32_1 = arith.constant 0 : i32
    %c0_i32_2 = arith.constant 0 : i32
    return %c0_i32, %c0_i32_0, %c0_i32_1 : i32, i32, i32
  }
  func.func @transform_2(%arg0: i32) -> (i32, i32) {
    %c0_i32 = arith.constant 0 : i32
    %c0_i32_0 = arith.constant 0 : i32
    %c0_i32_1 = arith.constant 0 : i32
    return %c0_i32, %c0_i32_0 : i32, i32
  }
  func.func @transform_3(%arg0: i32) -> (i32, i32, i32) {
    %c0_i32 = arith.constant 0 : i32
    %c0_i32_0 = arith.constant 0 : i32
    %c0_i32_1 = arith.constant 0 : i32
    %c0_i32_2 = arith.constant 0 : i32
    return %c0_i32, %c0_i32_0, %c0_i32_1 : i32, i32, i32
  }
  func.func @transform_4(%arg0: i32) -> (i32, i32, i32) {
    %c0_i32 = arith.constant 0 : i32
    %c0_i32_0 = arith.constant 0 : i32
    %c0_i32_1 = arith.constant 0 : i32
    %c0_i32_2 = arith.constant 0 : i32
    return %c0_i32, %c0_i32_0, %c0_i32_1 : i32, i32, i32
  }
  func.func @transform_5(%arg0: i32) -> (i32, i32, i32) {
    %c0_i32 = arith.constant 0 : i32
    %c0_i32_0 = arith.constant 0 : i32
    %c0_i32_1 = arith.constant 0 : i32
    %c0_i32_2 = arith.constant 0 : i32
    return %c0_i32, %c0_i32_0, %c0_i32_1 : i32, i32, i32
  }
  func.func @transform_6(%arg0: i32) -> (i32, i32, i32) {
    %c0_i32 = arith.constant 0 : i32
    %c0_i32_0 = arith.constant 0 : i32
    %c0_i32_1 = arith.constant 0 : i32
    %c0_i32_2 = arith.constant 0 : i32
    return %c0_i32, %c0_i32_0, %c0_i32_1 : i32, i32, i32
  }
  func.func @transform_7(%arg0: i32) -> (i32, i32) {
    %c0_i32 = arith.constant 0 : i32
    %c0_i32_0 = arith.constant 0 : i32
    %c0_i32_1 = arith.constant 0 : i32
    return %c0_i32, %c0_i32_0 : i32, i32
  }
  func.func @transform_8(%arg0: i32) -> (i32, i32) {
    %c0_i32 = arith.constant 0 : i32
    %c0_i32_0 = arith.constant 0 : i32
    %c0_i32_1 = arith.constant 0 : i32
    return %c0_i32, %c0_i32_0 : i32, i32
  }
  func.func @transform_9(%arg0: i32) -> (i32, i32) {
    %c0_i32 = arith.constant 0 : i32
    %c0_i32_0 = arith.constant 0 : i32
    return %arg0, %c0_i32 : i32, i32
  }
  func.func @transform_10(%arg0: i32) -> (i32, i32, i32) {
    %c0_i32 = arith.constant 0 : i32
    %c0_i32_0 = arith.constant 0 : i32
    %c0_i32_1 = arith.constant 0 : i32
    %c0_i32_2 = arith.constant 0 : i32
    return %c0_i32, %c0_i32_0, %c0_i32_1 : i32, i32, i32
  }
}

</mosaic_0001>

<bundles_post_ra>
// kernel: tpu_custom_call.1
= control target key start
LH: loop header
LB: loop body
LE: loop exit
PB: predicated region body
PF: predicated region fallthrough
CT: control target
= control target key end

     0   :  { %16 = vsyncpa [#allocation5], 0  ;;  %s2097_s0 = inlined_call_operand.vmem [shape: f32[128,16], index: 0, kind: input, shape index: {}]   ;;  %s2098_s1 = inlined_call_operand.vmem [shape: f32[2,8,32], index: 1, kind: input, shape index: {}]   ;;  %s2099_s2 = inlined_call_operand.hbm [shape: f32[16,96], index: 2, kind: input, shape index: {}]   ;;  %s2100_s3 = inlined_call_operand.vmem [shape: f32[1,32,96], index: 3, kind: input, shape index: {}]   ;;  %s2101_s4 = inlined_call_operand.vmem [shape: f32[2,32,64], index: 4, kind: input, shape index: {}]   ;;  %s2102_s5 = inlined_call_operand.vmem [shape: f32[2,32,32], index: 5, kind: input, shape index: {}]   ;;  %s2103_s6 = inlined_call_operand.vmem [shape: f32[2,1,96], index: 6, kind: input, shape index: {}]   ;;  %s2104_s7 = inlined_call_operand.vmem [shape: f32[32,16], index: 7, kind: input, shape index: {}]   ;;  %s2105_s8 = inlined_call_operand.vmem [shape: f32[1,16], index: 8, kind: input, shape index: {}]   ;;  %s2106_s9 = inlined_call_operand.vmem [shape: f32[128,16], index: 9, kind: output, shape index: {0}]   ;;  %s2107_s10 = inlined_call_operand.hbm [shape: f32[2,8,32], index: 10, kind: output, shape index: {1}]  }
   0x1   :  { %17 = vsyncpa [#allocation6], 0  ;;  %s1713_s13 = smov 0  }
   0x2 LB: > { %s283_s16 = sshll.u32 %s2099_s2, 4  ;;  %s1722_s17 = sadd.s32 4294967295, %s1647_s13   ;;  %s1647_s13 = sphi %s1713_s13, %s23_s13   ;;  %s284_s16 = int_to_ptr.hbm [resolvable:$true] %s283_s16 }
   0x3   : > { %p1427_p0 = scmp.ge.s32.totalorder %s1647_s13, 1  ;;  %p269_p1 = scmp.lt.s32.totalorder %s1647_s13, 5 }
   0x4   : > { %p1428_p2 = scmp.ne.s32.totalorder %s1722_s17, 0  ;;  %p1503_p3 = scmp.eq.s32.totalorder %s1722_s17, 0 }
   0x5   : > { %p270_p4 = pnand %p1427_p0, %p269_p1  ;;  %s1649_s18 = smov [#allocation4]  }
   0x6   : > { %s285_s19 = sshll.u32 %s1649_s18, 4  ;;  %s1650_s20 = smov 128   ;;  %s286_s19 = int_to_ptr.vmem [resolvable:$true] %s285_s19 }
   0x7   : > { %p1499_p5 = pneg %p270_p4  ;;  %s1651_s21 = smov 8  }
   0x8   : > { %328 = sbr.rel (%p270_p4) target bundleno = 3376 (0xd30), region = 56 }
   0x9   : > { %p1500_p6 = pnand %p1503_p3, %p1499_p5 }
   0xb   : > { %1502 = dma.hbm_to_vmem [thread:$0]  (!%p1500_p6), %s284_s16, 256, %s286_s19, [#allocation5], %s1650_s20, %s1650_s20, %s1651_s21  }
   0xd   : > { %1638 = dma.done.wait (%p1503_p3), [#allocation5], 256  }
   0xe   : > { %1640 = vsyncadd (%p1503_p3), [#allocation5], 4294967040  ;;  %s1432_s22 = sshll.u32 %s1722_s17, 2 }
   0xf   : > { %p368_p7 = scmp.lt.s32.totalorder %s1432_s22, 15  ;;  %382 = sbr.rel (%p1428_p2) target bundleno = 23 (0x17), region = 64 }
  0x11   : > { %s2109_s22 = smov (!%p368_p7, %s1432_s22), 15 }
  0x12   : > { %s1433_s23 = sshll.u32 %s2109_s22, 3 }
  0x13   : > { %s1732_s26 = scalar_lea.vmem %s2097_s0, %s1433_s23  ;;  %s1737_s29 = scalar_lea.vmem %s2106_s9, %s1433_s23 }
  0x14   : > { %v383_v0 = vld [vmem:[%s2098_s1] sm:$0xff]  ;;  %vm385_vm0 = vcmask 261120   ;;  %v384_v1 = vld [vmem:[%s2098_s1 + $0x8] sm:$0xff] }
  0x15   : > { %386 = vst.msk [vmem:[#allocation7] sm:$0xff] %vm385_vm0, %v383_v0 }
  0x16   : > { %387 = vst.msk [vmem:[#allocation7 + $0x8] sm:$0xff] %vm385_vm0, %v384_v1 }
  0x17 PF: > { %v393_v2 = vld [vmem:[#allocation4 + $0x8] sm:$0xff]  ;;  %v392_v3 = vld [vmem:[#allocation4] sm:$0xff]  ;;  %vm394_vm1 = vcmask 130048   ;;  %v1752_v6 = vld [vmem:[%s2101_s4 + $0x18] sm:$0xff]  ;;  %s1652_s20 = smov 32   ;;  %vm460_vm2 = vcmask 261120  }
  0x18   : > { %421 = vmatpush.msra.mxu0 %v393_v2  ;;  %1485 = vmatpush.msra.mxu1 %v393_v2  ;;  %v388_v4 = vld [vmem:[%s1732_s26] sm:$0xff]  ;;  %v389_v5 = vld [vmem:[%s1732_s26 + $0x8] sm:$0xff]  ;;  %v1759_v7 = vld [vmem:[%s2101_s4 + $0x10] sm:$0xff]  ;;  %vm436_vm3 = vcmask 785408   ;;  %s1653_s19 = smov 96   ;;  %s1654_s21 = smov 64  }
  0x19   : > { %1487 = vmatpush.msra.mxu3 %v393_v2  ;;  %1486 = vmatpush.msra.mxu2 %v393_v2  ;;  %v1769_v9 = vld [vmem:[%s2101_s4 + $0x8] sm:$0xff]  ;;  %v1775_v10 = vld [vmem:[%s2101_s4] sm:$0xff]  ;;  %v391_v18 = vld [vmem:[%s1732_s26 + $0x18] sm:$0xff]  ;;  %p1505_p8 = scmp.eq.s32.totalorder %s1722_s17, 3  ;;  %s1656_s14 = smov 128  }
  0x1a   : > { %422 = vmatpush.msra.mxu0 %v392_v3  ;;  %1488 = vmatpush.msra.mxu1 %v392_v3  ;;  %v1786_v13 = vld [vmem:[%s2103_s6] ss:$0 sm:$0xff]  ;;  %v1796_v19 = vld [vmem:[%s2102_s5 + $0x18] sm:$0xff]  ;;  %v1802_v20 = vld [vmem:[%s2102_s5 + $0x10] sm:$0xff]  ;;  %s1657_s15 = smov 8  }
  0x1b   : > { %1437 = vmatmul.msk.f32.vlgmr.msra.gmra.mxu0 %vm394_vm1, %v388_v4  ;;  %1438 = vmatmul.msk.f32.vlgmr.msra.gmra.mxu1 %vm394_vm1, %v389_v5  ;;  %v1809_v22 = vld [vmem:[%s2102_s5 + $0x8] sm:$0xff]  ;;  %v1816_v23 = vld [vmem:[%s2102_s5] sm:$0xff]  ;;  %v390_v41 = vld [vmem:[%s1732_s26 + $0x10] sm:$0xff] }
  0x1c   : > { %v1761_v8 = vld [vmem:[#allocation7] sm:$0xff]  ;;  %476 = vmatpush.msrb.mxu1 %v1752_v6  ;;  %1490 = vmatpush.msra.mxu3 %v392_v3  ;;  %v1445_v42 = vld [vmem:[%s2101_s4 + $0x38] sm:$0xff]  ;;  %v1443_v47 = vld [vmem:[%s2101_s4 + $0x28] sm:$0xff] }
  0x1d   : > { %533 = vrot.lane.b32.xlu0 %v1761_v8, %s1652_s20  ;;  %1489 = vmatpush.msra.mxu2 %v392_v3  ;;  %v1444_v43 = vld [vmem:[%s2101_s4 + $0x30] sm:$0xff]  ;;  %v1838_v44 = vld [vmem:[#allocation7 + $0x8] sm:$0xff]  ;;  %v1442_v48 = vld [vmem:[%s2101_s4 + $0x20] sm:$0xff] }
  0x1e   : > { %477 = vmatpush.msrb.mxu1 %v1759_v7  ;;  %1440 = vmatmul.msk.f32.vlgmr.msra.gmra.mxu3 %vm394_vm1, %v391_v18  ;;  %v1845_v45 = vld [vmem:[%s2100_s3 + $0x18] sm:$0xff]  ;;  %v1850_v46 = vld [vmem:[%s2100_s3 + $0x10] sm:$0xff]  ;;  %v1870_v53 = vld [vmem:[%s2100_s3 + $0x8] sm:$0xff] }
  0x1f   : > { %959 = vmatpush.msrb.mxu0 %v1796_v19  ;;  %558 = vmatpush.msrb.mxu3 %v1796_v19  ;;  %v1876_v54 = vld [vmem:[%s2100_s3] sm:$0xff] }
  0x20   : > { %478 = vmatpush.msrb.mxu1 %v1769_v9  ;;  %1439 = vmatmul.msk.f32.vlgmr.msra.gmra.mxu2 %vm394_vm1, %v390_v41  ;;  %v1894_v62 = vld [vmem:[%s2103_s6 + $0x1] ss:$0 sm:$0xff] }
  0x21   : > { %960 = vmatpush.msrb.mxu0 %v1802_v20  ;;  %559 = vmatpush.msrb.mxu3 %v1802_v20  ;;  %v1926_v18 = vld [vmem:[%s2102_s5 + $0x20] sm:$0xff] }
  0x22   : > { %479 = vmatpush.msrb.mxu1 %v1775_v10  ;;  %504 = vmatpush.msrb.mxu2 %v1445_v42 }
  0x23   : > { %1441 = vmatmul.msk.f32.vlgmr.msrb.gmra.mxu1 %vm460_vm2, %v1761_v8  ;;  %961 = vmatpush.msrb.mxu0 %v1809_v22 }
  0x24   : > { %560 = vmatpush.msrb.mxu3 %v1809_v22  ;;  %629 = vrot.lane.b32.xlu2 %v1838_v44, %s1652_s20 }
  0x25   : > { %962 = vmatpush.msrb.mxu0 %v1816_v23  ;;  %600 = vmatpush.msra.mxu1 %v1845_v45 }
  0x26   : > { %561 = vmatpush.msrb.mxu3 %v1816_v23  ;;  %505 = vmatpush.msrb.mxu2 %v1444_v43 }
  0x27   : > { %1105 = vmatpush.msra.mxu0 %v1445_v42  ;;  %601 = vmatpush.msra.mxu1 %v1850_v46 }
  0x28   : > { %690 = vmatpush.msra.mxu3 %v1752_v6  ;;  %506 = vmatpush.msrb.mxu2 %v1443_v47 }
  0x29   : > { %1106 = vmatpush.msra.mxu0 %v1444_v43  ;;  %602 = vmatpush.msra.mxu1 %v1870_v53 }
  0x2a   : > { %691 = vmatpush.msra.mxu3 %v1759_v7  ;;  %507 = vmatpush.msrb.mxu2 %v1442_v48 }
  0x2b   : > { %1107 = vmatpush.msra.mxu0 %v1443_v47  ;;  %1446 = vmatmul.msk.f32.vlgmr.msrb.gmra.mxu2 %vm460_vm2, %v1838_v44 }
  0x2c   : > { %692 = vmatpush.msra.mxu3 %v1769_v9  ;;  %603 = vmatpush.msra.mxu1 %v1876_v54 }
  0x2d   : > { %1108 = vmatpush.msra.mxu0 %v1442_v48 }
  0x2e   : > { %693 = vmatpush.msra.mxu3 %v1775_v10  ;;  %713 = vmatpush.msrb.mxu1 %v1445_v42 }
  0x30   : > { %714 = vmatpush.msrb.mxu1 %v1444_v43 }
  0x32   : > { %715 = vmatpush.msrb.mxu1 %v1443_v47 }
  0x34   : > { %716 = vmatpush.msrb.mxu1 %v1442_v48 }
  0x8f   : > { %v534_v33 = vpop.permute.xlu0 %533 }
  0x98   : > { %v424_v11 = vpop.f32.mrf.mxu0  ;;  %v427_v12 = vpop.f32.mrf.mxu1 }
  0x99   : > { %437 = vst.msk [vmem:[#allocation2] sm:$0xff] %vm436_vm3, %v424_v11  ;;  %v1907_v11 = vld [vmem:[%s2102_s5 + $0x38] sm:$0xff] }
  0x9a   : > { %438 = vst.msk [vmem:[#allocation2 + $0x8] sm:$0xff] %vm436_vm3, %v427_v12  ;;  %v1912_v12 = vld [vmem:[%s2102_s5 + $0x30] sm:$0xff]  ;;  %655 = vmatpush.msra.mxu2 %v1907_v11 }
  0x9c   : > { %656 = vmatpush.msra.mxu2 %v1912_v12 }
  0xa0   : > { %v1788_v14 = vld [vmem:[#allocation2] sm:$0xff]  ;;  %v481_v15 = vpop.f32.mrf.mxu1 }
  0xa1   : > { %v512_v16 = vadd.f32 %v481_v15, %v1788_v14  ;;  %v433_v38 = vpop.f32.mrf.mxu3  ;;  %v1900_v3 = vld [vmem:[#allocation2 + $0x8] sm:$0xff] }
  0xa2   : > { %440 = vst.msk [vmem:[#allocation2 + $0x18] sm:$0xff] %vm436_vm3, %v433_v38  ;;  %v1919_v15 = vld [vmem:[%s2102_s5 + $0x28] sm:$0xff] }
  0xa3   : > { %v513_v17 = vadd.f32 %v1786_v13, %v512_v16  ;;  %v430_v60 = vpop.f32.mrf.mxu2  ;;  %657 = vmatpush.msra.mxu2 %v1919_v15 }
  0xa4   : > { %439 = vst.msk [vmem:[#allocation2 + $0x10] sm:$0xff] %vm436_vm3, %v430_v60 }
  0xa5   : > { %v1447_v21 = vmul.f32 -1.442695, %v513_v17  ;;  %658 = vmatpush.msra.mxu2 %v1926_v18 }
  0xa7   : > { %1527 = vpow2.f32 %v1447_v21  ;;  %763 = vmatpush.msrb.mxu2 %v1796_v19 }
  0xa9   : > { %764 = vmatpush.msrb.mxu2 %v1802_v20 }
  0xab   : > { %765 = vmatpush.msrb.mxu2 %v1809_v22 }
  0xad   : > { %v1528_v24 = vpop.eup %1527  ;;  %766 = vmatpush.msrb.mxu2 %v1816_v23 }
  0xae   : > { %v517_v25 = vadd.f32 1.0, %v1528_v24  ;;  %v509_v61 = vpop.f32.mrf.mxu2 }
  0xb0   : > { %1529 = vrcp.f32 %v517_v25  ;;  %v529_v29 = vand.u32 2147483648, %v517_v25  ;;  %v527_v31 = vand.u32 2147483647, %v517_v25  ;;  %vm523_vm5 = vweird.f32 %v517_v25 }
  0xb2   : > { %v530_v34 = vor.u32 1.1754944e-38, %v529_v29  ;;  %vm528_vm7 = vcmp.eq.f32.partialorder %v527_v31, 8.507059e+37 }
  0xb6   : > { %v1530_v26 = vpop.eup %1529 }
  0xb7   : > { %v519_v27 = vmul.f32 %v1530_v26, %v517_v25  ;;  %vm524_vm4 = vweird.f32 %v1530_v26 }
  0xb8   : > { %vm525_vm6 = vmor %vm523_vm5, %vm524_vm4 }
  0xb9   : > { %v520_v28 = vsub.f32 1.0, %v519_v27 }
  0xbb   : > { %v521_v30 = vmul.f32 %v1530_v26, %v520_v28 }
  0xbd   : > { %v522_v32 = vadd.f32 %v1530_v26, %v521_v30 }
  0xbf   : > { %v526_v35 = vsel %vm525_vm6, %v1530_v26, %v522_v32  ;;  %v630_v32 = vpop.permute.xlu2 %629 }
  0xc0   : > { %v531_v36 = vsel %vm528_vm7, %v530_v34, %v526_v35 }
  0xc1   : > { %v536_v37 = vmul.f32 %v534_v33, %v531_v36  ;;  %v574_v55 = vsub.f32 1.0, %v531_v36  ;;  %v573_v57 = vmul.f32 %v531_v36, %v1761_v8 }
  0xc3   : > { %542 = vrot.lane.b32.xlu0 %v536_v37, %s1653_s19 }
 0x135   : > { %v543_v39 = vpop.permute.xlu0 %542 }
 0x136   : > { %1448 = vmatmul.msk.f32.vlgmr.msrb.gmra.mxu3 %vm460_vm2, %v543_v39 }
 0x137   : > { %801 = vmatpush.msrb.mxu3 %v1845_v45 }
 0x139   : > { %802 = vmatpush.msrb.mxu3 %v1850_v46 }
 0x13b   : > { %803 = vmatpush.msrb.mxu3 %v1870_v53 }
 0x13d   : > { %804 = vmatpush.msrb.mxu3 %v1876_v54 }
 0x1b9   : > { %v563_v40 = vpop.f32.mrf.mxu3 }
 0x1ba   : > { %567 = vrot.lane.b32.xlu1 %v563_v40, %s1654_s21 }
 0x22c   : > { %v568_v49 = vpop.permute.xlu1 %567 }
 0x22d   : > { %v570_v50 = vadd.f32 %v568_v49, %v1788_v14 }
 0x22f   : > { %v571_v51 = vadd.f32 %v1786_v13, %v570_v50 }
 0x231   : > { %1531 = vtanh.f32 %v571_v51 }
 0x237   : > { %v1532_v52 = vpop.eup %1531 }
 0x238   : > { %576 = vrot.lane.b32.xlu1 %v1532_v52, %s1654_s21 }
 0x2aa   : > { %v577_v56 = vpop.permute.xlu1 %576 }
 0x2ab   : > { %v579_v58 = vmul.f32 %v577_v56, %v574_v55 }
 0x2ad   : > { %v1882_v59 = vadd.f32 %v579_v58, %v573_v57 }
 0x2af   : > { %742 = vrot.lane.b32.xlu2 %v1882_v59, %s1652_s20  ;;  %1449 = vmatmul.msk.f32.vlgmr.msra.gmra.mxu1 %vm460_vm2, %v1882_v59 }
 0x2b0   : > { %1456 = vmatmul.msk.f32.vlgmr.msra.gmra.mxu3 %vm460_vm2, %v1882_v59  ;;  %851 = vmatpush.msra.mxu1 %v1907_v11 }
 0x2b1   : > { %909 = vmatpush.msra.mxu3 %v1445_v42 }
 0x2b2   : > { %852 = vmatpush.msra.mxu1 %v1912_v12 }
 0x2b3   : > { %910 = vmatpush.msra.mxu3 %v1444_v43 }
 0x2b4   : > { %853 = vmatpush.msra.mxu1 %v1919_v15 }
 0x2b5   : > { %911 = vmatpush.msra.mxu3 %v1443_v47 }
 0x2b6   : > { %854 = vmatpush.msra.mxu1 %v1926_v18 }
 0x2b7   : > { %912 = vmatpush.msra.mxu3 %v1442_v48 }
 0x309   : > { %v743_v49 = vpop.permute.xlu2 %742 }
 0x32c   : > { %v1896_v63 = vpop.f32.mrf.mxu1 }
 0x32d   : > { %v608_v0 = vadd.f32 %v1896_v63, %v509_v61 }
 0x32f   : > { %v609_v1 = vadd.f32 %v1894_v62, %v608_v0 }
 0x331   : > { %v1450_v2 = vmul.f32 -1.442695, %v609_v1 }
 0x333   : > { %1533 = vpow2.f32 %v1450_v2  ;;  %v695_v4 = vpop.f32.mrf.mxu3 }
 0x334   : > { %v721_v5 = vadd.f32 %v695_v4, %v1900_v3 }
 0x336   : > { %v722_v8 = vadd.f32 %v1786_v13, %v721_v5 }
 0x338   : > { %v1458_v14 = vmul.f32 -1.442695, %v722_v8 }
 0x339   : > { %v1534_v16 = vpop.eup %1533 }
 0x33a   : > { %v613_v17 = vadd.f32 1.0, %v1534_v16  ;;  %1535 = vpow2.f32 %v1458_v14 }
 0x33c   : > { %1537 = vrcp.f32 %v613_v17  ;;  %v625_v28 = vand.u32 2147483648, %v613_v17  ;;  %v623_v30 = vand.u32 2147483647, %v613_v17  ;;  %vm619_vm9 = vweird.f32 %v613_v17 }
 0x33e   : > { %v626_v34 = vor.u32 1.1754944e-38, %v625_v28  ;;  %vm624_vm11 = vcmp.eq.f32.partialorder %v623_v30, 8.507059e+37 }
 0x340   : > { %v1536_v21 = vpop.eup %1535 }
 0x341   : > { %v726_v24 = vadd.f32 1.0, %v1536_v21 }
 0x342   : > { %v1538_v25 = vpop.eup %1537 }
 0x343   : > { %1539 = vrcp.f32 %v726_v24  ;;  %v615_v26 = vmul.f32 %v1538_v25, %v613_v17  ;;  %vm620_vm8 = vweird.f32 %v1538_v25  ;;  %v738_v40 = vand.u32 2147483648, %v726_v24 }
 0x344   : > { %vm621_vm10 = vmor %vm619_vm9, %vm620_vm8  ;;  %v736_v42 = vand.u32 2147483647, %v726_v24  ;;  %vm732_vm13 = vweird.f32 %v726_v24 }
 0x345   : > { %v616_v27 = vsub.f32 1.0, %v615_v26  ;;  %v739_v47 = vor.u32 1.1754944e-38, %v738_v40 }
 0x346   : > { %vm737_vm15 = vcmp.eq.f32.partialorder %v736_v42, 8.507059e+37 }
 0x347   : > { %v617_v29 = vmul.f32 %v1538_v25, %v616_v27 }
 0x349   : > { %v1540_v31 = vpop.eup %1539  ;;  %v618_v33 = vadd.f32 %v1538_v25, %v617_v29 }
 0x34a   : > { %v728_v35 = vmul.f32 %v1540_v31, %v726_v24  ;;  %vm733_vm12 = vweird.f32 %v1540_v31 }
 0x34b   : > { %v622_v36 = vsel %vm621_vm10, %v1538_v25, %v618_v33  ;;  %vm734_vm14 = vmor %vm732_vm13, %vm733_vm12 }
 0x34c   : > { %v627_v37 = vsel %vm624_vm11, %v626_v34, %v622_v36  ;;  %v729_v38 = vsub.f32 1.0, %v728_v35 }
 0x34d   : > { %v632_v39 = vmul.f32 %v630_v32, %v627_v37  ;;  %v671_v8 = vsub.f32 1.0, %v627_v37  ;;  %v670_v16 = vmul.f32 %v627_v37, %v1838_v44 }
 0x34e   : > { %v730_v41 = vmul.f32 %v1540_v31, %v729_v38 }
 0x34f   : > { %639 = vrot.lane.b32.xlu0 %v632_v39, %s1653_s19 }
 0x350   : > { %v731_v43 = vadd.f32 %v1540_v31, %v730_v41 }
 0x352   : > { %v735_v48 = vsel %vm734_vm14, %v1540_v31, %v731_v43 }
 0x353   : > { %v740_v50 = vsel %vm737_vm15, %v739_v47, %v735_v48 }
 0x354   : > { %v745_v51 = vmul.f32 %v743_v49, %v740_v50  ;;  %v778_v44 = vmul.f32 %v740_v50, %v1882_v59 }
 0x356   : > { %747 = vrot.lane.b32.xlu1 %v745_v51, %s1653_s19 }
 0x3c1   : > { %v640_v52 = vpop.permute.xlu0 %639 }
 0x3c2   : > { %1455 = vmatmul.msk.f32.vlgmr.msra.gmra.mxu2 %vm460_vm2, %v640_v52 }
 0x3c3   : > { %886 = vmatpush.msra.mxu2 %v1752_v6 }
 0x3c5   : > { %887 = vmatpush.msra.mxu2 %v1759_v7 }
 0x3c7   : > { %888 = vmatpush.msra.mxu2 %v1769_v9 }
 0x3c8   : > { %v748_v55 = vpop.permute.xlu1 %747 }
 0x3c9   : > { %889 = vmatpush.msra.mxu2 %v1775_v10 }
 0x3ca   : > { %1459 = vmatmul.msk.f32.vlgmr.msrb.gmra.mxu2 %vm460_vm2, %v748_v55 }
 0x3cb   : > { %1047 = vmatpush.msrb.mxu2 %v1907_v11 }
 0x3cd   : > { %1048 = vmatpush.msrb.mxu2 %v1912_v12 }
 0x3cf   : > { %1049 = vmatpush.msrb.mxu2 %v1919_v15 }
 0x3d1   : > { %1050 = vmatpush.msrb.mxu2 %v1926_v18 }
 0x445   : > { %v660_v56 = vpop.f32.mrf.mxu2 }
 0x446   : > { %664 = vrot.lane.b32.xlu0 %v660_v56, %s1654_s21 }
 0x44d   : > { %v768_v57 = vpop.f32.mrf.mxu2 }
 0x44e   : > { %772 = vrot.lane.b32.xlu2 %v768_v57, %s1654_s21 }
 0x4a8   : > { %v773_v58 = vpop.permute.xlu2 %772 }
 0x4a9   : > { %v775_v60 = vadd.f32 %v773_v58, %v1900_v3 }
 0x4ab   : > { %v776_v61 = vadd.f32 %v1786_v13, %v775_v60 }
 0x4ad   : > { %1541 = vtanh.f32 %v776_v61 }
 0x4b3   : > { %v1542_v0 = vpop.eup %1541 }
 0x4b4   : > { %781 = vrot.lane.b32.xlu1 %v1542_v0, %s1654_s21 }
 0x4b8   : > { %v665_v1 = vpop.permute.xlu0 %664 }
 0x4b9   : > { %v667_v2 = vadd.f32 %v665_v1, %v1896_v63  ;;  %v779_v63 = vsub.f32 1.0, %v740_v50 }
 0x4bb   : > { %v668_v4 = vadd.f32 %v1894_v62, %v667_v2 }
 0x4bd   : > { %1543 = vtanh.f32 %v668_v4 }
 0x4c3   : > { %v1544_v5 = vpop.eup %1543 }
 0x4c4   : > { %673 = vrot.lane.b32.xlu2 %v1544_v5, %s1654_s21 }
 0x51e   : > { %v674_v14 = vpop.permute.xlu2 %673 }
 0x51f   : > { %v676_v3 = vmul.f32 %v674_v14, %v671_v8 }
 0x521   : > { %v1957_v17 = vadd.f32 %v676_v3, %v670_v16 }
 0x523   : > { %1266 = vst.msk [vmem:[#allocation3] sm:$0xff] %vm460_vm2, %v1957_v17  ;;  %830 = vrot.lane.b32.xlu0 %v1957_v17, %s1652_s20  ;;  %1457 = vmatmul.msk.f32.vlgmr.msrb.gmra.mxu1 %vm460_vm2, %v1957_v17 }
 0x524   : > { %997 = vmatpush.msrb.mxu1 %v1845_v45 }
 0x526   : > { %v782_v21 = vpop.permute.xlu1 %781  ;;  %998 = vmatpush.msrb.mxu1 %v1850_v46 }
 0x527   : > { %v784_v24 = vmul.f32 %v782_v21, %v779_v63 }
 0x528   : > { %999 = vmatpush.msrb.mxu1 %v1870_v53 }
 0x529   : > { %v1969_v25 = vadd.f32 %v784_v24, %v778_v44 }
 0x52a   : > { %1000 = vmatpush.msrb.mxu1 %v1876_v54 }
 0x52b   : > { %938 = vrot.lane.b32.xlu1 %v1969_v25, %s1652_s20  ;;  %1460 = vmatmul.msk.f32.vlgmr.msrb.gmra.mxu3 %vm460_vm2, %v1969_v25 }
 0x52c   : > { %1463 = vmatmul.msk.f32.vlgmr.msra.gmra.mxu2 %vm460_vm2, %v1969_v25  ;;  %1082 = vmatpush.msrb.mxu3 %v1752_v6  ;;  %v1989_v6 = vld [vmem:[#allocation2 + $0x10] sm:$0xff] }
 0x52d   : > { %1193 = vmatpush.msra.mxu2 %v1845_v45 }
 0x52e   : > { %1083 = vmatpush.msrb.mxu3 %v1759_v7 }
 0x52f   : > { %1194 = vmatpush.msra.mxu2 %v1850_v46 }
 0x530   : > { %1084 = vmatpush.msrb.mxu3 %v1769_v9 }
 0x531   : > { %1195 = vmatpush.msra.mxu2 %v1870_v53 }
 0x532   : > { %1085 = vmatpush.msrb.mxu3 %v1775_v10 }
 0x533   : > { %1196 = vmatpush.msra.mxu2 %v1876_v54 }
 0x595   : > { %v831_v51 = vpop.permute.xlu0 %830 }
 0x59d   : > { %v939_v56 = vpop.permute.xlu1 %938 }
 0x5a0   : > { %v718_v59 = vpop.f32.mrf.mxu1 }
 0x5ae   : > { %v1986_v26 = vpop.f32.mrf.mxu3 }
 0x5af   : > { %v809_v27 = vadd.f32 %v1986_v26, %v718_v59  ;;  %v891_v45 = vpop.f32.mrf.mxu2 }
 0x5b0   : > { %v917_v7 = vadd.f32 %v891_v45, %v1989_v6 }
 0x5b1   : > { %v810_v46 = vadd.f32 %v1894_v62, %v809_v27 }
 0x5b2   : > { %v918_v9 = vadd.f32 %v1786_v13, %v917_v7 }
 0x5b3   : > { %v1461_v28 = vmul.f32 -1.442695, %v810_v46 }
 0x5b4   : > { %v1465_v53 = vmul.f32 -1.442695, %v918_v9  ;;  %v455_v9 = vld [vmem:[#allocation2 + $0x18] sm:$0xff] }
 0x5b5   : > { %1545 = vpow2.f32 %v1461_v28 }
 0x5b6   : > { %1547 = vpow2.f32 %v1465_v53 }
 0x5bb   : > { %v1546_v10 = vpop.eup %1545 }
 0x5bc   : > { %v1548_v54 = vpop.eup %1547  ;;  %v814_v29 = vadd.f32 1.0, %v1546_v10 }
 0x5bd   : > { %v922_v30 = vadd.f32 1.0, %v1548_v54 }
 0x5be   : > { %1549 = vrcp.f32 %v814_v29  ;;  %v826_v37 = vand.u32 2147483648, %v814_v29  ;;  %v824_v40 = vand.u32 2147483647, %v814_v29  ;;  %vm820_vm4 = vweird.f32 %v814_v29 }
 0x5bf   : > { %1551 = vrcp.f32 %v922_v30  ;;  %v934_v38 = vand.u32 2147483648, %v922_v30  ;;  %v932_v42 = vand.u32 2147483647, %v922_v30  ;;  %vm928_vm5 = vweird.f32 %v922_v30 }
 0x5c0   : > { %v827_v48 = vor.u32 1.1754944e-38, %v826_v37  ;;  %vm825_vm8 = vcmp.eq.f32.partialorder %v824_v40, 8.507059e+37 }
 0x5c1   : > { %v935_v49 = vor.u32 1.1754944e-38, %v934_v38  ;;  %vm933_vm9 = vcmp.eq.f32.partialorder %v932_v42, 8.507059e+37 }
 0x5c4   : > { %v1550_v31 = vpop.eup %1549 }
 0x5c5   : > { %v1552_v32 = vpop.eup %1551  ;;  %v816_v33 = vmul.f32 %v1550_v31, %v814_v29  ;;  %vm821_vm0 = vweird.f32 %v1550_v31 }
 0x5c6   : > { %v924_v34 = vmul.f32 %v1552_v32, %v922_v30  ;;  %vm929_vm3 = vweird.f32 %v1552_v32  ;;  %vm822_vm6 = vmor %vm820_vm4, %vm821_vm0 }
 0x5c7   : > { %v817_v35 = vsub.f32 1.0, %v816_v33  ;;  %vm930_vm7 = vmor %vm928_vm5, %vm929_vm3 }
 0x5c8   : > { %v925_v36 = vsub.f32 1.0, %v924_v34 }
 0x5c9   : > { %v818_v39 = vmul.f32 %v1550_v31, %v817_v35 }
 0x5ca   : > { %v926_v41 = vmul.f32 %v1552_v32, %v925_v36 }
 0x5cb   : > { %v819_v43 = vadd.f32 %v1550_v31, %v818_v39 }
 0x5cc   : > { %v927_v47 = vadd.f32 %v1552_v32, %v926_v41 }
 0x5cd   : > { %v823_v50 = vsel %vm822_vm6, %v1550_v31, %v819_v43 }
 0x5ce   : > { %v931_v52 = vsel %vm930_vm7, %v1552_v32, %v927_v47  ;;  %v828_v55 = vsel %vm825_vm8, %v827_v48, %v823_v50 }
 0x5cf   : > { %v936_v57 = vsel %vm933_vm9, %v935_v49, %v931_v52  ;;  %v833_v58 = vmul.f32 %v831_v51, %v828_v55  ;;  %v867_v16 = vsub.f32 1.0, %v828_v55  ;;  %v866_v21 = vmul.f32 %v828_v55, %v1957_v17 }
 0x5d0   : > { %v941_v60 = vmul.f32 %v939_v56, %v936_v57  ;;  %v975_v63 = vsub.f32 1.0, %v936_v57  ;;  %v974_v59 = vmul.f32 %v936_v57, %v1969_v25 }
 0x5d1   : > { %835 = vrot.lane.b32.xlu2 %v833_v58, %s1653_s19 }
 0x5d2   : > { %943 = vrot.lane.b32.xlu0 %v941_v60, %s1653_s19 }
 0x62b   : > { %v836_v61 = vpop.permute.xlu2 %835 }
 0x62c   : > { %1462 = vmatmul.msk.f32.vlgmr.msra.gmra.mxu1 %vm460_vm2, %v836_v61 }
 0x62d   : > { %1155 = vmatpush.msra.mxu1 %v1796_v19 }
 0x62f   : > { %1156 = vmatpush.msra.mxu1 %v1802_v20 }
 0x631   : > { %1157 = vmatpush.msra.mxu1 %v1809_v22 }
 0x633   : > { %1158 = vmatpush.msra.mxu1 %v1816_v23 }
 0x644   : > { %v944_v0 = vpop.permute.xlu0 %943 }
 0x645   : > { %1466 = vmatmul.msk.f32.vlgmr.msrb.gmra.mxu0 %vm460_vm2, %v944_v0 }
 0x6a9   : > { %v856_v1 = vpop.f32.mrf.mxu1 }
 0x6aa   : > { %860 = vrot.lane.b32.xlu1 %v856_v1, %s1654_s21 }
 0x6c2   : > { %v964_v2 = vpop.f32.mrf.mxu0 }
 0x6c3   : > { %968 = vrot.lane.b32.xlu2 %v964_v2, %s1654_s21 }
 0x71c   : > { %v861_v4 = vpop.permute.xlu1 %860 }
 0x71d   : > { %v863_v5 = vadd.f32 %v861_v4, %v1986_v26  ;;  %v969_v8 = vpop.permute.xlu2 %968 }
 0x71e   : > { %v971_v19 = vadd.f32 %v969_v8, %v1989_v6 }
 0x71f   : > { %v864_v20 = vadd.f32 %v1894_v62, %v863_v5 }
 0x720   : > { %v972_v22 = vadd.f32 %v1786_v13, %v971_v19 }
 0x721   : > { %1553 = vtanh.f32 %v864_v20 }
 0x722   : > { %1555 = vtanh.f32 %v972_v22 }
 0x727   : > { %v1554_v23 = vpop.eup %1553 }
 0x728   : > { %v1556_v14 = vpop.eup %1555  ;;  %869 = vrot.lane.b32.xlu0 %v1554_v23, %s1654_s21 }
 0x729   : > { %977 = vrot.lane.b32.xlu1 %v1556_v14, %s1654_s21 }
 0x79a   : > { %v870_v3 = vpop.permute.xlu0 %869 }
 0x79b   : > { %v872_v44 = vmul.f32 %v870_v3, %v867_v16  ;;  %v978_v24 = vpop.permute.xlu1 %977 }
 0x79c   : > { %v980_v26 = vmul.f32 %v978_v24, %v975_v63  ;;  %v1276_v24 = vld [vmem:[%s2104_s7] sm:$0xff] }
 0x79d   : > { %v2012_v27 = vadd.f32 %v872_v44, %v866_v21  ;;  %v1278_v21 = vld [vmem:[%s2104_s7 + $0x10] sm:$0xff]  ;;  %v1277_v44 = vld [vmem:[%s2104_s7 + $0x8] sm:$0xff] }
 0x79e   : > { %v2014_v6 = vadd.f32 %v980_v26, %v974_v59 }
 0x79f   : > { %1267 = vst.msk [vmem:[#allocation3 + $0x8] sm:$0xff] %vm460_vm2, %v2012_v27  ;;  %1026 = vrot.lane.b32.xlu2 %v2012_v27, %s1652_s20  ;;  %1464 = vmatmul.msk.f32.vlgmr.msra.gmra.mxu3 %vm460_vm2, %v2012_v27 }
 0x7a0   : > { %1134 = vrot.lane.b32.xlu0 %v2014_v6, %s1652_s20  ;;  %1467 = vmatmul.msk.f32.vlgmr.msrb.gmra.mxu1 %vm460_vm2, %v2014_v6 }
 0x7a1   : > { %1243 = vmatpush.msra.mxu3 %v1907_v11 }
 0x7a3   : > { %1244 = vmatpush.msra.mxu3 %v1912_v12 }
 0x7a5   : > { %1245 = vmatpush.msra.mxu3 %v1919_v15 }
 0x7a7   : > { %1470 = vmatmul.msk.f32.vlgmr.msrb.gmra.mxu3 %vm460_vm2, %v2014_v6 }
 0x7a8   : > { %1246 = vmatpush.msra.mxu3 %v1926_v18 }
 0x7f9   : > { %v1027_v40 = vpop.permute.xlu2 %1026 }
 0x812   : > { %v1135_v55 = vpop.permute.xlu0 %1134 }
 0x81d   : > { %v2032_v17 = vpop.f32.mrf.mxu1 }
 0x822   : > { %v914_v25 = vpop.f32.mrf.mxu3 }
 0x823   : > { %v1005_v45 = vadd.f32 %v2032_v17, %v914_v25 }
 0x825   : > { %v1006_v7 = vadd.f32 %v1894_v62, %v1005_v45  ;;  %v1272_v45 = vld [vmem:[#allocation3] sm:$0xff] }
 0x827   : > { %v1468_v46 = vmul.f32 -1.442695, %v1006_v7  ;;  %v1273_v7 = vld [vmem:[#allocation3 + $0x8] sm:$0xff] }
 0x829   : > { %1557 = vpow2.f32 %v1468_v46 }
 0x82a   : > { %v1087_v11 = vpop.f32.mrf.mxu3 }
 0x82b   : > { %v1113_v28 = vadd.f32 %v1087_v11, %v455_v9 }
 0x82d   : > { %v1114_v12 = vadd.f32 %v1786_v13, %v1113_v28 }
 0x82f   : > { %v1558_v15 = vpop.eup %1557  ;;  %v1472_v53 = vmul.f32 -1.442695, %v1114_v12 }
 0x830   : > { %v1010_v10 = vadd.f32 1.0, %v1558_v15  ;;  %v1526_v15 = vld [vmem:[%s2105_s8] ss:$0 sm:$0xff] }
 0x831   : > { %1559 = vpow2.f32 %v1472_v53 }
 0x832   : > { %1561 = vrcp.f32 %v1010_v10  ;;  %v1022_v32 = vand.u32 2147483648, %v1010_v10  ;;  %v1020_v34 = vand.u32 2147483647, %v1010_v10  ;;  %vm1016_vm11 = vweird.f32 %v1010_v10 }
 0x834   : > { %v1023_v37 = vor.u32 1.1754944e-38, %v1022_v32  ;;  %vm1021_vm13 = vcmp.eq.f32.partialorder %v1020_v34, 8.507059e+37 }
 0x837   : > { %v1560_v18 = vpop.eup %1559 }
 0x838   : > { %v1562_v54 = vpop.eup %1561  ;;  %v1118_v29 = vadd.f32 1.0, %v1560_v18 }
 0x839   : > { %v1012_v30 = vmul.f32 %v1562_v54, %v1010_v10  ;;  %vm1017_vm10 = vweird.f32 %v1562_v54 }
 0x83a   : > { %1563 = vrcp.f32 %v1118_v29  ;;  %vm1018_vm12 = vmor %vm1016_vm11, %vm1017_vm10  ;;  %v1130_v47 = vand.u32 2147483648, %v1118_v29  ;;  %v1128_v49 = vand.u32 2147483647, %v1118_v29  ;;  %vm1124_vm15 = vweird.f32 %v1118_v29 }
 0x83b   : > { %v1013_v31 = vsub.f32 1.0, %v1012_v30 }
 0x83c   : > { %v1131_v51 = vor.u32 1.1754944e-38, %v1130_v47  ;;  %vm1129_vm3 = vcmp.eq.f32.partialorder %v1128_v49, 8.507059e+37 }
 0x83d   : > { %v1014_v33 = vmul.f32 %v1562_v54, %v1013_v31 }
 0x83f   : > { %v1015_v35 = vadd.f32 %v1562_v54, %v1014_v33 }
 0x840   : > { %v1564_v36 = vpop.eup %1563 }
 0x841   : > { %v1019_v38 = vsel %vm1018_vm12, %v1562_v54, %v1015_v35  ;;  %v1120_v39 = vmul.f32 %v1564_v36, %v1118_v29  ;;  %vm1125_vm14 = vweird.f32 %v1564_v36 }
 0x842   : > { %v1024_v41 = vsel %vm1021_vm13, %v1023_v37, %v1019_v38  ;;  %vm1126_vm0 = vmor %vm1124_vm15, %vm1125_vm14 }
 0x843   : > { %v1029_v42 = vmul.f32 %v1027_v40, %v1024_v41  ;;  %v1121_v43 = vsub.f32 1.0, %v1120_v39  ;;  %v1063_v59 = vsub.f32 1.0, %v1024_v41 }
 0x845   : > { %1031 = vrot.lane.b32.xlu1 %v1029_v42, %s1653_s19  ;;  %v1122_v48 = vmul.f32 %v1564_v36, %v1121_v43 }
 0x847   : > { %v1123_v50 = vadd.f32 %v1564_v36, %v1122_v48 }
 0x849   : > { %v1127_v52 = vsel %vm1126_vm0, %v1564_v36, %v1123_v50 }
 0x84a   : > { %v1132_v56 = vsel %vm1129_vm3, %v1131_v51, %v1127_v52 }
 0x84b   : > { %v1137_v57 = vmul.f32 %v1135_v55, %v1132_v56  ;;  %v1171_v23 = vsub.f32 1.0, %v1132_v56  ;;  %v1170_v16 = vmul.f32 %v1132_v56, %v2014_v6  ;;  %v1062_v6 = vmul.f32 %v1024_v41, %v2012_v27 }
 0x84d   : > { %1139 = vrot.lane.b32.xlu2 %v1137_v57, %s1653_s19 }
 0x8a7   : > { %v1140_v58 = vpop.permute.xlu2 %1139 }
 0x8a8   : > { %1473 = vmatmul.msk.f32.vlgmr.msra.gmra.mxu1 %vm460_vm2, %v1140_v58 }
 0x8b7   : > { %v1032_v60 = vpop.permute.xlu1 %1031 }
 0x8b8   : > { %1469 = vmatmul.msk.f32.vlgmr.msrb.gmra.mxu2 %vm460_vm2, %v1032_v60 }
 0x925   : > { %v1160_v61 = vpop.f32.mrf.mxu1 }
 0x926   : > { %1164 = vrot.lane.b32.xlu0 %v1160_v61, %s1654_s21 }
 0x93b   : > { %v1052_v0 = vpop.f32.mrf.mxu2 }
 0x93c   : > { %1056 = vrot.lane.b32.xlu1 %v1052_v0, %s1654_s21 }
 0x998   : > { %v1165_v1 = vpop.permute.xlu0 %1164 }
 0x999   : > { %v1167_v2 = vadd.f32 %v1165_v1, %v455_v9 }
 0x99b   : > { %v1168_v4 = vadd.f32 %v1786_v13, %v1167_v2  ;;  %v1279_v13 = vld [vmem:[%s2104_s7 + $0x18] sm:$0xff] }
 0x99c   : > { %1308 = vmatpush.msrb.mxu0 %v1279_v13 }
 0x99d   : > { %1565 = vtanh.f32 %v1168_v4 }
 0x99e   : > { %1309 = vmatpush.msrb.mxu0 %v1278_v21 }
 0x9a0   : > { %1310 = vmatpush.msrb.mxu0 %v1277_v44 }
 0x9a2   : > { %1311 = vmatpush.msrb.mxu0 %v1276_v24 }
 0x9a3   : > { %v1566_v5 = vpop.eup %1565 }
 0x9a4   : > { %1173 = vrot.lane.b32.xlu2 %v1566_v5, %s1654_s21 }
 0x9ae   : > { %v1057_v8 = vpop.permute.xlu1 %1056 }
 0x9af   : > { %v1059_v19 = vadd.f32 %v1057_v8, %v2032_v17 }
 0x9b1   : > { %v1060_v20 = vadd.f32 %v1894_v62, %v1059_v19 }
 0x9b3   : > { %1567 = vtanh.f32 %v1060_v20 }
 0x9b9   : > { %v1568_v22 = vpop.eup %1567 }
 0x9ba   : > { %1065 = vrot.lane.b32.xlu0 %v1568_v22, %s1654_s21 }
 0x9fe   : > { %v1174_v14 = vpop.permute.xlu2 %1173 }
 0x9ff   : > { %v1176_v3 = vmul.f32 %v1174_v14, %v1171_v23 }
 0xa01   : > { %v1177_v63 = vadd.f32 %v1176_v3, %v1170_v16 }
 0xa03   : > { %1270 = vst.msk [vmem:[#allocation7] sm:$0xff] %vm460_vm2, %v1177_v63  ;;  %1474 = vmatmul.msk.f32.vlgmr.msra.gmra.mxu2 %vm460_vm2, %v1177_v63 }
 0xa2c   : > { %v1066_v26 = vpop.permute.xlu0 %1065 }
 0xa2d   : > { %v1068_v17 = vmul.f32 %v1066_v26, %v1063_v59 }
 0xa2f   : > { %v1069_v25 = vadd.f32 %v1068_v17, %v1062_v6 }
 0xa31   : > { %1268 = vst.msk [vmem:[#allocation3 + $0x10] sm:$0xff] %vm460_vm2, %v1069_v25  ;;  %1222 = vrot.lane.b32.xlu1 %v1069_v25, %s1652_s20  ;;  %1471 = vmatmul.msk.f32.vlgmr.msra.gmra.mxu0 %vm460_vm2, %v1069_v25 }
 0xa38   : > { %v1274_v46 = vld [vmem:[#allocation3 + $0x10] sm:$0xff] }
 0xa39   : > { %1477 = vmatmul.msk.f32.vlgmr.msrb.gmra.mxu0 %vm460_vm2, %v1272_v45 }
 0xa41   : > { %1478 = vmatmul.msk.f32.gmra.mxu0 %vm460_vm2, %v1273_v7 }
 0xa49   : > { %1479 = vmatmul.msk.f32.gmra.mxu0 %vm460_vm2, %v1274_v46 }
 0xa86   : > { %v1198_v27 = vpop.f32.mrf.mxu2 }
 0xaa3   : > { %v1223_v42 = vpop.permute.xlu1 %1222 }
 0xaae   : > { %v1110_v9 = vpop.f32.mrf.mxu0 }
 0xaaf   : > { %v1201_v11 = vadd.f32 %v1198_v27, %v1110_v9 }
 0xab1   : > { %v1202_v28 = vadd.f32 %v1894_v62, %v1201_v11 }
 0xab3   : > { %v1475_v12 = vmul.f32 -1.442695, %v1202_v28 }
 0xab5   : > { %1569 = vpow2.f32 %v1475_v12 }
 0xab6   : > { %v1313_v53 = vpop.f32.mrf.mxu0 }
 0xab7   : > { %v1314_v10 = vadd.f32 %v1526_v15, %v1313_v53 }
 0xab9   : > { %1325 = vst.msk [vmem:[%s1737_s29] sm:$0xff] %vm394_vm1, %v1314_v10 }
 0xabb   : > { %v1570_v18 = vpop.eup %1569 }
 0xabc   : > { %v1206_v54 = vadd.f32 1.0, %v1570_v18 }
 0xabe   : > { %1571 = vrcp.f32 %v1206_v54  ;;  %v1316_v29 = vpop.f32.mrf.mxu0  ;;  %v1218_v36 = vand.u32 2147483648, %v1206_v54  ;;  %v1216_v38 = vand.u32 2147483647, %v1206_v54  ;;  %vm1212_vm5 = vweird.f32 %v1206_v54 }
 0xabf   : > { %v1317_v30 = vadd.f32 %v1526_v15, %v1316_v29 }
 0xac0   : > { %v1219_v40 = vor.u32 1.1754944e-38, %v1218_v36  ;;  %vm1217_vm7 = vcmp.eq.f32.partialorder %v1216_v38, 8.507059e+37 }
 0xac1   : > { %1326 = vst.msk [vmem:[%s1737_s29 + $0x8] sm:$0xff] %vm394_vm1, %v1317_v30 }
 0xac4   : > { %v1572_v31 = vpop.eup %1571 }
 0xac5   : > { %v1208_v32 = vmul.f32 %v1572_v31, %v1206_v54  ;;  %vm1213_vm4 = vweird.f32 %v1572_v31 }
 0xac6   : > { %v1319_v33 = vpop.f32.mrf.mxu0  ;;  %vm1214_vm6 = vmor %vm1212_vm5, %vm1213_vm4 }
 0xac7   : > { %v1320_v34 = vadd.f32 %v1526_v15, %v1319_v33  ;;  %v1209_v35 = vsub.f32 1.0, %v1208_v32 }
 0xac9   : > { %1327 = vst.msk [vmem:[%s1737_s29 + $0x10] sm:$0xff] %vm394_vm1, %v1320_v34  ;;  %v1210_v37 = vmul.f32 %v1572_v31, %v1209_v35 }
 0xacb   : > { %v1211_v39 = vadd.f32 %v1572_v31, %v1210_v37 }
 0xacd   : > { %v1215_v41 = vsel %vm1214_vm6, %v1572_v31, %v1211_v39 }
 0xace   : > { %v1220_v43 = vsel %vm1217_vm7, %v1219_v40, %v1215_v41 }
 0xacf   : > { %v1225_v47 = vmul.f32 %v1223_v42, %v1220_v43  ;;  %v1259_v56 = vsub.f32 1.0, %v1220_v43  ;;  %v1258_v58 = vmul.f32 %v1220_v43, %v1069_v25 }
 0xad1   : > { %1227 = vrot.lane.b32.xlu2 %v1225_v47, %s1653_s19  ;;  %s1655_s19 = smov [#allocation7]  }
 0xad2   : > { %s1343_s30 = sshll.u32 %s1655_s19, 4  ;;  %s1344_s30 = int_to_ptr.vmem [resolvable:$true] %s1343_s30 }
 0xb2b   : > { %v1228_v48 = vpop.permute.xlu2 %1227 }
 0xb2c   : > { %1476 = vmatmul.msk.f32.vlgmr.msra.gmra.mxu3 %vm460_vm2, %v1228_v48 }
 0xbaf   : > { %v1248_v49 = vpop.f32.mrf.mxu3 }
 0xbb0   : > { %1252 = vrot.lane.b32.xlu0 %v1248_v49, %s1654_s21 }
 0xc22   : > { %v1253_v50 = vpop.permute.xlu0 %1252 }
 0xc23   : > { %v1255_v51 = vadd.f32 %v1253_v50, %v1198_v27 }
 0xc25   : > { %v1256_v52 = vadd.f32 %v1894_v62, %v1255_v51 }
 0xc27   : > { %1573 = vtanh.f32 %v1256_v52 }
 0xc2d   : > { %v1574_v55 = vpop.eup %1573 }
 0xc2e   : > { %1261 = vrot.lane.b32.xlu1 %v1574_v55, %s1654_s21  ;;  %s1345_s21 = sshll.u32 %s2107_s10, 4  ;;  %s1346_s21 = int_to_ptr.hbm [resolvable:$true] %s1345_s21 }
 0xca0   : > { %v1262_v57 = vpop.permute.xlu1 %1261 }
 0xca1   : > { %v1264_v60 = vmul.f32 %v1262_v57, %v1259_v56 }
 0xca3   : > { %v1265_v61 = vadd.f32 %v1264_v60, %v1258_v58 }
 0xca5   : > { %1269 = vst.msk [vmem:[#allocation3 + $0x18] sm:$0xff] %vm460_vm2, %v1265_v61 }
 0xca6   : > { %1271 = vst.msk [vmem:[#allocation7 + $0x8] sm:$0xff] %vm460_vm2, %v1265_v61 }
 0xca7   : > { %1496 = dma.vmem_to_hbm [thread:$0]  (%p1505_p8), %s1344_s30, 256, %s1346_s21, [#allocation6], %s1656_s14, %s1656_s14, %s1657_s15  }
 0xcac   : > { %v1275_v0 = vld [vmem:[#allocation3 + $0x18] sm:$0xff] }
 0xcad   : > { %1480 = vmatmul.msk.f32.gmra.mxu0 %vm460_vm2, %v1275_v0 }
 0xd2a   : > { %v1322_v62 = vpop.f32.mrf.mxu0 }
 0xd2b   : > { %v1323_v1 = vadd.f32 %v1526_v15, %v1322_v62 }
 0xd2d   : > { %1328 = vst.msk [vmem:[%s1737_s29 + $0x18] sm:$0xff] %vm394_vm1, %v1323_v1 }
 0xd2e   : > { %1642 = dma.done.wait (%p1505_p8), [#allocation6], 256  }
 0xd2f   : > { %1644 = vsyncadd (%p1505_p8), [#allocation6], 4294967040 }
 0xd30 PF: > { %s23_s13 = sadd.s32 1, %s1647_s13  }
 0xd31   : > { %p20_p9 = scmp.ge.s32.totalorder %s23_s13, 6  }
 0xd33   :  { %22 = sbr.rel (!%p20_p9) target bundleno = 2 (0x2), region = 107 }
 0xd38   :  { %1370 = vsyncpa [#allocation5], 1 }
 0xd39   :  { %1372 = vsyncpa [#allocation5 + $0x1], 1 }
 0xd3a   :  { %1373 = vsyncpa [#allocation6], 1 }
 0xd3b   :  { %1375 = vsyncpa [#allocation6 + $0x1], 1 }

</bundles_post_ra>
